<compile_context>
chip_gen: v7x
topology: tpu7x:2x2x1
jax: 0.10.0
libtpu: 0.0.40
codegen_flags: <defaults>
</compile_context>

<pallas_src>
import functools
import math

import jax
import jax.numpy as jnp
from jax.experimental import pallas as pl
from jax.experimental.pallas import tpu as pltpu

_SQRT_HALF = 0.7071067811865476
_BF16 = jnp.bfloat16
_F32 = jnp.float32


def _erf(z):
    # Abramowitz & Stegun 7.1.26 rational approximation (|err| <= 1.5e-7);
    # exp lands on the EUP, rest is VPU mul/add.
    a1, a2, a3, a4, a5 = 0.254829592, -0.284496736, 1.421413741, -1.453152027, 1.061405429
    p = 0.3275911
    sign = jnp.where(z >= 0.0, 1.0, -1.0)
    za = jnp.abs(z)
    t = 1.0 / (1.0 + p * za)
    poly = ((((a5 * t + a4) * t + a3) * t + a2) * t + a1) * t
    return sign * (1.0 - poly * jnp.exp(-za * za))


def _gelu_exact(x):
    return 0.5 * x * (1.0 + _erf(x * _SQRT_HALF))


def _layernorm(z, g, b, eps):
    mu = jnp.mean(z, axis=-1, keepdims=True)
    c = z - mu
    var = jnp.mean(c * c, axis=-1, keepdims=True)
    return c * jax.lax.rsqrt(var + eps) * g + b


# ------------------------------ fused kernel ------------------------------

def _decoder_kernel(q_ref, x_ref, wq_ref, wkv_ref, wo_ref, w1_ref, w2_ref,
                    bkv_ref, b1_ref, vece_ref, o_ref, ctx_ref,
                    *, num_heads, head_dim, eps):
    query = q_ref[...].astype(_F32)              # (L, E)  this batch row
    xsrc = x_ref[...].astype(_F32)               # (S, E)

    vece = vece_ref[...]                         # (8, E) packed per-feature vectors
    bq, bo, b2 = vece[0:1, :], vece[1:2, :], vece[2:3, :]
    ln1_g, ln1_b = vece[3:4, :], vece[4:5, :]
    ln2_g, ln2_b = vece[5:6, :], vece[6:7, :]

    E = num_heads * head_dim

    # ---- input projections: bf16 MXU operands, f32 accumulation.
    # 1/sqrt(head_dim) is pre-folded into wq / bq on the host.
    q = jnp.dot(query.astype(_BF16), wq_ref[...],
                preferred_element_type=_F32) + bq                      # (L, E)
    kv = jnp.dot(xsrc.astype(_BF16), wkv_ref[...],
                 preferred_element_type=_F32) + bkv_ref[...]           # (S, 2E)
    q16, kv16 = q.astype(_BF16), kv.astype(_BF16)

    # ---- multi-head attention (dense per-batch, no mask needed).
    # ctx of every head is written into its lane slice of a (L, E) scratch so
    # the out-projection below is one K=E matmul instead of 8 K=head_dim ones.
    # (At real head_dim a head-major relayout / batched dot_general would
    #  replace the per-head lane slicing; at hd=16 toy size it is negligible.)
    for h in range(num_heads):
        lo = h * head_dim
        hi = lo + head_dim
        s = jax.lax.dot_general(q16[:, lo:hi], kv16[:, lo:hi],
                                (((1,), (1,)), ((), ())),
                                preferred_element_type=_F32)           # (L, S)
        m = jnp.max(s, axis=-1, keepdims=True)
        p = jnp.exp(s - m)
        p = p / jnp.sum(p, axis=-1, keepdims=True)   # exact normalization (f32)
        ctx_ref[:, lo:hi] = jnp.dot(p.astype(_BF16), kv16[:, E + lo:E + hi],
                                    preferred_element_type=_F32)       # (L, hd)
    # TODO(synk): dropout (p=0.1) on attention weights / outputs skipped
    #             (inference mode).

    attn = jnp.dot(ctx_ref[...].astype(_BF16), wo_ref[...],
                   preferred_element_type=_F32) + bo                   # (L, E)

    # ---- residual + LayerNorm1 (f32)
    res1 = _layernorm(query + attn, ln1_g, ln1_b, eps)

    # ---- MLP: Linear -> GELU(exact erf) -> Linear, residual + LayerNorm2
    h1 = jnp.dot(res1.astype(_BF16), w1_ref[...],
                 preferred_element_type=_F32) + b1_ref[...]
    h1 = _gelu_exact(h1)
    mlp = jnp.dot(h1.astype(_BF16), w2_ref[...],
                  preferred_element_type=_F32) + b2
    o_ref[...] = _layernorm(res1 + mlp, ln2_g, ln2_b, eps).astype(o_ref.dtype)


# ------------------------------ host wrappers ------------------------------

def prepare_decoder_params(params, num_heads):
    """One-time param fusion / dtype prep, kept out of the per-call path."""
    E = params["wq"].shape[0]
    scale = 1.0 / math.sqrt(E // num_heads)
    return dict(
        wq=(params["wq"] * scale).astype(_BF16),                       # scale folded
        wkv=jnp.concatenate([params["wk"], params["wv"]], axis=1).astype(_BF16),
        wo=params["wo"].astype(_BF16),
        w1=params["w1"].astype(_BF16),
        w2=params["w2"].astype(_BF16),
        bkv=jnp.concatenate([params["bk"], params["bv"]]).reshape(1, 2 * E).astype(_F32),
        b1=params["b1"].reshape(1, -1).astype(_F32),
        vecE=jnp.stack([params["bq"] * scale, params["bo"], params["b2"],
                        params["ln1_g"], params["ln1_b"],
                        params["ln2_g"], params["ln2_b"],
                        jnp.zeros((E,), _F32)], axis=0).astype(_F32),
    )


def decoder_forward(x, query, fused, num_heads=8):
    """x: (S, N, E) key/value source, query: (L, N, E); returns (L, N, E)."""
    L, N, E = query.shape
    S = x.shape[0]
    hd = E // num_heads
    hidden = fused["w1"].shape[1]

    # batch-major layout: one grid step per batch row -> dense (L, S) attention
    # with no batch mask; the batch axis is a "parallel" grid dimension.
    qb = jnp.transpose(query, (1, 0, 2)).astype(_F32)    # (N, L, E)
    xb = jnp.transpose(x, (1, 0, 2)).astype(_F32)        # (N, S, E)

    def whole(shape):        # weight / bias blocks stay VMEM-resident
        return pl.BlockSpec(shape, lambda n: (0,) * len(shape))

    kernel = functools.partial(_decoder_kernel, num_heads=num_heads,
                               head_dim=hd, eps=1e-12)
    out = pl.pallas_call(
        kernel,
        out_shape=jax.ShapeDtypeStruct((N, L, E), _F32),
        grid_spec=pltpu.PrefetchScalarGridSpec(
            num_scalar_prefetch=0,
            grid=(N,),
            in_specs=[
                pl.BlockSpec((None, L, E), lambda n: (n, 0, 0)),   # query row
                pl.BlockSpec((None, S, E), lambda n: (n, 0, 0)),   # x row
                whole((E, E)),          # wq (scale folded, bf16)
                whole((E, 2 * E)),      # wkv (bf16)
                whole((E, E)),          # wo (bf16)
                whole((E, hidden)),     # w1 (bf16)
                whole((hidden, E)),     # w2 (bf16)
                whole((1, 2 * E)),      # bkv (f32)
                whole((1, hidden)),     # b1 (f32)
                whole((8, E)),          # packed bq/bo/b2 + LN gamma/beta (f32)
            ],
            out_specs=pl.BlockSpec((None, L, E), lambda n: (n, 0, 0)),
            scratch_shapes=[pltpu.VMEM((L, E), _F32)],              # packed ctx
        ),
        compiler_params=pltpu.CompilerParams(
            dimension_semantics=("parallel",)),
    )(qb, xb, fused["wq"], fused["wkv"], fused["wo"], fused["w1"], fused["w2"],
      fused["bkv"], fused["b1"], fused["vecE"])
    return jnp.transpose(out, (1, 0, 2))


# ------------------------------ reference & setup ------------------------------

def decoder_reference(x, query, params, num_heads=8, matmul_dtype=jnp.float32):
    """Plain-JAX reference. matmul_dtype=float32 reproduces the exact PyTorch
    f32 forward; matmul_dtype=bfloat16 mirrors the kernel's mixed precision
    (bf16 matmul operands, f32 accumulation, f32 softmax/LN/GELU)."""
    L, N, E = query.shape
    S = x.shape[0]
    hd = E // num_heads
    scale = 1.0 / math.sqrt(hd)
    md = matmul_dtype

    def dot(a, b):
        return jnp.dot(a.astype(md), b.astype(md), preferred_element_type=jnp.float32)

    q2 = dot(query.reshape(L * N, E), params["wq"] * scale) + params["bq"] * scale
    k2 = dot(x.reshape(S * N, E), params["wk"]) + params["bk"]
    v2 = dot(x.reshape(S * N, E), params["wv"]) + params["bv"]
    qh = q2.reshape(L, N, num_heads, hd).transpose(1, 2, 0, 3)
    kh = k2.reshape(S, N, num_heads, hd).transpose(1, 2, 0, 3)
    vh = v2.reshape(S, N, num_heads, hd).transpose(1, 2, 0, 3)
    s = jnp.einsum("nhld,nhsd->nhls", qh.astype(md), kh.astype(md),
                   preferred_element_type=jnp.float32)
    p = jax.nn.softmax(s, axis=-1)
    a = jnp.einsum("nhls,nhsd->nhld", p.astype(md), vh.astype(md),
                   preferred_element_type=jnp.float32)
    a = a.transpose(2, 0, 1, 3).reshape(L * N, E)
    attn = dot(a, params["wo"]) + params["bo"]

    def ln(z, g, b):
        mu = z.mean(-1, keepdims=True)
        var = ((z - mu) ** 2).mean(-1, keepdims=True)
        return (z - mu) * jax.lax.rsqrt(var + 1e-12) * g + b

    res1 = ln(query.reshape(L * N, E) + attn, params["ln1_g"], params["ln1_b"])
    h = jax.nn.gelu(dot(res1, params["w1"]) + params["b1"], approximate=False)
    mlp = dot(h, params["w2"]) + params["b2"]
    out = ln(res1 + mlp, params["ln2_g"], params["ln2_b"])
    return out.reshape(L, N, E)


def init_params(key, dim, hidden_dim):
    ks = jax.random.split(key, 12)
    w = lambda k, shape: 0.1 * jax.random.normal(k, shape, jnp.float32)
    return dict(
        wq=w(ks[0], (dim, dim)), bq=w(ks[1], (dim,)),
        wk=w(ks[2], (dim, dim)), bk=w(ks[3], (dim,)),
        wv=w(ks[4], (dim, dim)), bv=w(ks[5], (dim,)),
        wo=w(ks[6], (dim, dim)), bo=w(ks[7], (dim,)),
        w1=w(ks[8], (dim, hidden_dim)), b1=w(ks[9], (hidden_dim,)),
        w2=w(ks[10], (hidden_dim, dim)), b2=w(ks[11], (dim,)),
        ln1_g=jnp.ones((dim,), jnp.float32), ln1_b=jnp.zeros((dim,), jnp.float32),
        ln2_g=jnp.ones((dim,), jnp.float32), ln2_b=jnp.zeros((dim,), jnp.float32),
    )


if __name__ == "__main__":
    # small but lane-dense shapes: E = 128 lanes, head_dim = 16, hidden = 512
    dim, hidden_dim, num_heads = 128, 512, 8
    L, S, N = 8, 16, 2                           # tgt seq, src seq, batch

    key = jax.random.PRNGKey(0)
    kp, kx, kq = jax.random.split(key, 3)
    params = init_params(kp, dim, hidden_dim)
    x = jax.random.normal(kx, (S, N, dim), jnp.float32)       # key/value source
    query = jax.random.normal(kq, (L, N, dim), jnp.float32)   # decoder query

    fused = prepare_decoder_params(params, num_heads)         # one-time prep

    fwd = jax.jit(functools.partial(decoder_forward, num_heads=num_heads))
    out = jax.block_until_ready(fwd(x, query, fused))
    assert out.shape == (L, N, dim)

    # (1) tight check against a reference that mirrors the kernel's mixed
    #     precision (validates the kernel logic itself).
    ref_mixed = decoder_reference(x, query, params, num_heads, jnp.bfloat16)
    err_mixed = float(jnp.max(jnp.abs(out - ref_mixed)))
    assert jnp.allclose(out, ref_mixed, atol=2e-3, rtol=2e-3), err_mixed

    # (2) sanity check against the exact f32 (PyTorch-semantics) reference; the
    #     gap is the expected bf16-MXU rounding envelope, not a logic error.
    ref_f32 = decoder_reference(x, query, params, num_heads, jnp.float32)
    err_f32 = float(jnp.max(jnp.abs(out - ref_f32)))
    assert jnp.allclose(out, ref_f32, atol=5e-2, rtol=5e-2), err_f32

    print("KERNEL_OK")
</pallas_src>

<mosaic_0001>
module attributes {stable_mosaic.version = 11 : i64} {
  func.func @_decoder_kernel(%arg0: i32, %arg1: memref<1x8x128xf32, #tpu.memory_space<vmem>>, %arg2: memref<1x16x128xf32, #tpu.memory_space<vmem>>, %arg3: memref<128x128xbf16, #tpu.memory_space<vmem>>, %arg4: memref<128x256xbf16, #tpu.memory_space<vmem>>, %arg5: memref<128x128xbf16, #tpu.memory_space<vmem>>, %arg6: memref<128x512xbf16, #tpu.memory_space<vmem>>, %arg7: memref<512x128xbf16, #tpu.memory_space<vmem>>, %arg8: memref<1x256xf32, #tpu.memory_space<vmem>>, %arg9: memref<1x512xf32, #tpu.memory_space<vmem>>, %arg10: memref<8x128xf32, #tpu.memory_space<vmem>>, %arg11: memref<1x8x128xf32, #tpu.memory_space<vmem>>, %arg12: memref<8x128xf32, #tpu.memory_space<vmem>>) attributes {dimension_semantics = [#tpu.dimension_semantics<parallel>], iteration_bounds = array<i64: 2>, scalar_prefetch = 0 : i64, scratch_operands = 1 : i64, tpu.core_type = #tpu.core_type<tc>, window_params = [{transform_indices = @transform_0, window_bounds = array<i64: 1, 8, 128>}, {transform_indices = @transform_1, window_bounds = array<i64: 1, 16, 128>}, {pipeline_mode = #tpu.pipeline_mode<synchronous>, transform_indices = @transform_2, window_bounds = array<i64: 128, 128>}, {pipeline_mode = #tpu.pipeline_mode<synchronous>, transform_indices = @transform_3, window_bounds = array<i64: 128, 256>}, {pipeline_mode = #tpu.pipeline_mode<synchronous>, transform_indices = @transform_4, window_bounds = array<i64: 128, 128>}, {pipeline_mode = #tpu.pipeline_mode<synchronous>, transform_indices = @transform_5, window_bounds = array<i64: 128, 512>}, {pipeline_mode = #tpu.pipeline_mode<synchronous>, transform_indices = @transform_6, window_bounds = array<i64: 512, 128>}, {pipeline_mode = #tpu.pipeline_mode<synchronous>, transform_indices = @transform_7, window_bounds = array<i64: 1, 256>}, {pipeline_mode = #tpu.pipeline_mode<synchronous>, transform_indices = @transform_8, window_bounds = array<i64: 1, 512>}, {pipeline_mode = #tpu.pipeline_mode<synchronous>, transform_indices = @transform_9, window_bounds = array<i64: 8, 128>}, {transform_indices = @transform_10, window_bounds = array<i64: 1, 8, 128>}]} {
    %c0 = arith.constant 0 : index
    %c0_0 = arith.constant 0 : index
    %c0_1 = arith.constant 0 : index
    %0 = vector.load %arg1[%c0, %c0_0, %c0_1] : memref<1x8x128xf32, #tpu.memory_space<vmem>>, vector<1x8x128xf32>
    %1 = vector.shape_cast %0 : vector<1x8x128xf32> to vector<8x128xf32>
    %c0_2 = arith.constant 0 : index
    %c0_3 = arith.constant 0 : index
    %c0_4 = arith.constant 0 : index
    %2 = vector.load %arg2[%c0_2, %c0_3, %c0_4] : memref<1x16x128xf32, #tpu.memory_space<vmem>>, vector<1x16x128xf32>
    %3 = vector.shape_cast %2 : vector<1x16x128xf32> to vector<16x128xf32>
    %c0_5 = arith.constant 0 : index
    %c0_6 = arith.constant 0 : index
    %4 = vector.load %arg10[%c0_5, %c0_6] : memref<8x128xf32, #tpu.memory_space<vmem>>, vector<8x128xf32>
    %5 = vector.extract_strided_slice %4 {offsets = [0, 0], sizes = [1, 128], strides = [1, 1]} : vector<8x128xf32> to vector<1x128xf32>
    %6 = vector.extract_strided_slice %4 {offsets = [1, 0], sizes = [1, 128], strides = [1, 1]} : vector<8x128xf32> to vector<1x128xf32>
    %7 = vector.extract_strided_slice %4 {offsets = [2, 0], sizes = [1, 128], strides = [1, 1]} : vector<8x128xf32> to vector<1x128xf32>
    %8 = vector.extract_strided_slice %4 {offsets = [3, 0], sizes = [1, 128], strides = [1, 1]} : vector<8x128xf32> to vector<1x128xf32>
    %9 = vector.extract_strided_slice %4 {offsets = [4, 0], sizes = [1, 128], strides = [1, 1]} : vector<8x128xf32> to vector<1x128xf32>
    %10 = vector.extract_strided_slice %4 {offsets = [5, 0], sizes = [1, 128], strides = [1, 1]} : vector<8x128xf32> to vector<1x128xf32>
    %11 = vector.extract_strided_slice %4 {offsets = [6, 0], sizes = [1, 128], strides = [1, 1]} : vector<8x128xf32> to vector<1x128xf32>
    %12 = arith.truncf %1 : vector<8x128xf32> to vector<8x128xbf16>
    %c0_7 = arith.constant 0 : index
    %c0_8 = arith.constant 0 : index
    %13 = vector.load %arg3[%c0_7, %c0_8] : memref<128x128xbf16, #tpu.memory_space<vmem>>, vector<128x128xbf16>
    %cst = arith.constant dense<0.000000e+00> : vector<8x128xf32>
    %14 = tpu.matmul %12, %13, %cst {dimension_numbers = #tpu.dot_dimension_numbers<[1], [0], [0], [1], [0, 0, 1, 1], [], []>} : vector<8x128xbf16>, vector<128x128xbf16>, vector<8x128xf32> -> vector<8x128xf32>
    %15 = vector.broadcast %5 : vector<1x128xf32> to vector<8x128xf32>
    %16 = arith.addf %14, %15 : vector<8x128xf32>
    %17 = arith.truncf %3 : vector<16x128xf32> to vector<16x128xbf16>
    %c0_9 = arith.constant 0 : index
    %c0_10 = arith.constant 0 : index
    %18 = vector.load %arg4[%c0_9, %c0_10] : memref<128x256xbf16, #tpu.memory_space<vmem>>, vector<128x256xbf16>
    %cst_11 = arith.constant dense<0.000000e+00> : vector<16x256xf32>
    %19 = tpu.matmul %17, %18, %cst_11 {dimension_numbers = #tpu.dot_dimension_numbers<[1], [0], [0], [1], [0, 0, 1, 1], [], []>} : vector<16x128xbf16>, vector<128x256xbf16>, vector<16x256xf32> -> vector<16x256xf32>
    %c0_12 = arith.constant 0 : index
    %c0_13 = arith.constant 0 : index
    %20 = vector.load %arg8[%c0_12, %c0_13] : memref<1x256xf32, #tpu.memory_space<vmem>>, vector<1x256xf32>
    %21 = vector.broadcast %20 : vector<1x256xf32> to vector<16x256xf32>
    %22 = arith.addf %19, %21 : vector<16x256xf32>
    %23 = arith.truncf %16 : vector<8x128xf32> to vector<8x128xbf16>
    %24 = arith.truncf %22 : vector<16x256xf32> to vector<16x256xbf16>
    %25 = vector.extract_strided_slice %23 {offsets = [0, 0], sizes = [8, 16], strides = [1, 1]} : vector<8x128xbf16> to vector<8x16xbf16>
    %26 = vector.extract_strided_slice %24 {offsets = [0, 0], sizes = [16, 16], strides = [1, 1]} : vector<16x256xbf16> to vector<16x16xbf16>
    %cst_14 = arith.constant dense<0.000000e+00> : vector<8x16xf32>
    %27 = tpu.matmul %25, %26, %cst_14 {dimension_numbers = #tpu.dot_dimension_numbers<[1], [1], [0], [0], [0, 0, 1, 0], [], []>} : vector<8x16xbf16>, vector<16x16xbf16>, vector<8x16xf32> -> vector<8x16xf32>
    %cst_15 = arith.constant dense<0xFF800000> : vector<8xf32>
    %28 = vector.multi_reduction <maximumf>, %27, %cst_15 [1] : vector<8x16xf32> to vector<8xf32>
    %29 = vector.shape_cast %28 : vector<8xf32> to vector<8x1xf32>
    %30 = vector.broadcast %29 : vector<8x1xf32> to vector<8x16xf32>
    %31 = arith.subf %27, %30 : vector<8x16xf32>
    %32 = math.exp %31 : vector<8x16xf32>
    %cst_16 = arith.constant dense<0.000000e+00> : vector<8xf32>
    %33 = vector.multi_reduction <add>, %32, %cst_16 [1] : vector<8x16xf32> to vector<8xf32>
    %34 = vector.shape_cast %33 : vector<8xf32> to vector<8x1xf32>
    %35 = vector.broadcast %34 : vector<8x1xf32> to vector<8x16xf32>
    %36 = arith.divf %32, %35 : vector<8x16xf32>
    %37 = arith.truncf %36 : vector<8x16xf32> to vector<8x16xbf16>
    %38 = vector.extract_strided_slice %24 {offsets = [0, 128], sizes = [16, 16], strides = [1, 1]} : vector<16x256xbf16> to vector<16x16xbf16>
    %cst_17 = arith.constant dense<0.000000e+00> : vector<8x16xf32>
    %39 = tpu.matmul %37, %38, %cst_17 {dimension_numbers = #tpu.dot_dimension_numbers<[1], [0], [0], [1], [0, 0, 1, 1], [], []>} : vector<8x16xbf16>, vector<16x16xbf16>, vector<8x16xf32> -> vector<8x16xf32>
    %c0_18 = arith.constant 0 : index
    %c0_19 = arith.constant 0 : index
    %40 = vector.load %arg12[%c0_18, %c0_19] : memref<8x128xf32, #tpu.memory_space<vmem>>, vector<8x16xf32>
    tpu.vector_store %arg12[%c0_18, %c0_19], %39 {strides = array<i32>} : memref<8x128xf32, #tpu.memory_space<vmem>>, vector<8x16xf32>,
    %41 = vector.extract_strided_slice %23 {offsets = [0, 16], sizes = [8, 16], strides = [1, 1]} : vector<8x128xbf16> to vector<8x16xbf16>
    %42 = vector.extract_strided_slice %24 {offsets = [0, 16], sizes = [16, 16], strides = [1, 1]} : vector<16x256xbf16> to vector<16x16xbf16>
    %cst_20 = arith.constant dense<0.000000e+00> : vector<8x16xf32>
    %43 = tpu.matmul %41, %42, %cst_20 {dimension_numbers = #tpu.dot_dimension_numbers<[1], [1], [0], [0], [0, 0, 1, 0], [], []>} : vector<8x16xbf16>, vector<16x16xbf16>, vector<8x16xf32> -> vector<8x16xf32>
    %cst_21 = arith.constant dense<0xFF800000> : vector<8xf32>
    %44 = vector.multi_reduction <maximumf>, %43, %cst_21 [1] : vector<8x16xf32> to vector<8xf32>
    %45 = vector.shape_cast %44 : vector<8xf32> to vector<8x1xf32>
    %46 = vector.broadcast %45 : vector<8x1xf32> to vector<8x16xf32>
    %47 = arith.subf %43, %46 : vector<8x16xf32>
    %48 = math.exp %47 : vector<8x16xf32>
    %cst_22 = arith.constant dense<0.000000e+00> : vector<8xf32>
    %49 = vector.multi_reduction <add>, %48, %cst_22 [1] : vector<8x16xf32> to vector<8xf32>
    %50 = vector.shape_cast %49 : vector<8xf32> to vector<8x1xf32>
    %51 = vector.broadcast %50 : vector<8x1xf32> to vector<8x16xf32>
    %52 = arith.divf %48, %51 : vector<8x16xf32>
    %53 = arith.truncf %52 : vector<8x16xf32> to vector<8x16xbf16>
    %54 = vector.extract_strided_slice %24 {offsets = [0, 144], sizes = [16, 16], strides = [1, 1]} : vector<16x256xbf16> to vector<16x16xbf16>
    %cst_23 = arith.constant dense<0.000000e+00> : vector<8x16xf32>
    %55 = tpu.matmul %53, %54, %cst_23 {dimension_numbers = #tpu.dot_dimension_numbers<[1], [0], [0], [1], [0, 0, 1, 1], [], []>} : vector<8x16xbf16>, vector<16x16xbf16>, vector<8x16xf32> -> vector<8x16xf32>
    %c0_24 = arith.constant 0 : index
    %c16 = arith.constant 16 : index
    %56 = vector.load %arg12[%c0_24, %c16] : memref<8x128xf32, #tpu.memory_space<vmem>>, vector<8x16xf32>
    tpu.vector_store %arg12[%c0_24, %c16], %55 {strides = array<i32>} : memref<8x128xf32, #tpu.memory_space<vmem>>, vector<8x16xf32>,
    %57 = vector.extract_strided_slice %23 {offsets = [0, 32], sizes = [8, 16], strides = [1, 1]} : vector<8x128xbf16> to vector<8x16xbf16>
    %58 = vector.extract_strided_slice %24 {offsets = [0, 32], sizes = [16, 16], strides = [1, 1]} : vector<16x256xbf16> to vector<16x16xbf16>
    %cst_25 = arith.constant dense<0.000000e+00> : vector<8x16xf32>
    %59 = tpu.matmul %57, %58, %cst_25 {dimension_numbers = #tpu.dot_dimension_numbers<[1], [1], [0], [0], [0, 0, 1, 0], [], []>} : vector<8x16xbf16>, vector<16x16xbf16>, vector<8x16xf32> -> vector<8x16xf32>
    %cst_26 = arith.constant dense<0xFF800000> : vector<8xf32>
    %60 = vector.multi_reduction <maximumf>, %59, %cst_26 [1] : vector<8x16xf32> to vector<8xf32>
    %61 = vector.shape_cast %60 : vector<8xf32> to vector<8x1xf32>
    %62 = vector.broadcast %61 : vector<8x1xf32> to vector<8x16xf32>
    %63 = arith.subf %59, %62 : vector<8x16xf32>
    %64 = math.exp %63 : vector<8x16xf32>
    %cst_27 = arith.constant dense<0.000000e+00> : vector<8xf32>
    %65 = vector.multi_reduction <add>, %64, %cst_27 [1] : vector<8x16xf32> to vector<8xf32>
    %66 = vector.shape_cast %65 : vector<8xf32> to vector<8x1xf32>
    %67 = vector.broadcast %66 : vector<8x1xf32> to vector<8x16xf32>
    %68 = arith.divf %64, %67 : vector<8x16xf32>
    %69 = arith.truncf %68 : vector<8x16xf32> to vector<8x16xbf16>
    %70 = vector.extract_strided_slice %24 {offsets = [0, 160], sizes = [16, 16], strides = [1, 1]} : vector<16x256xbf16> to vector<16x16xbf16>
    %cst_28 = arith.constant dense<0.000000e+00> : vector<8x16xf32>
    %71 = tpu.matmul %69, %70, %cst_28 {dimension_numbers = #tpu.dot_dimension_numbers<[1], [0], [0], [1], [0, 0, 1, 1], [], []>} : vector<8x16xbf16>, vector<16x16xbf16>, vector<8x16xf32> -> vector<8x16xf32>
    %c0_29 = arith.constant 0 : index
    %c32 = arith.constant 32 : index
    %72 = vector.load %arg12[%c0_29, %c32] : memref<8x128xf32, #tpu.memory_space<vmem>>, vector<8x16xf32>
    tpu.vector_store %arg12[%c0_29, %c32], %71 {strides = array<i32>} : memref<8x128xf32, #tpu.memory_space<vmem>>, vector<8x16xf32>,
    %73 = vector.extract_strided_slice %23 {offsets = [0, 48], sizes = [8, 16], strides = [1, 1]} : vector<8x128xbf16> to vector<8x16xbf16>
    %74 = vector.extract_strided_slice %24 {offsets = [0, 48], sizes = [16, 16], strides = [1, 1]} : vector<16x256xbf16> to vector<16x16xbf16>
    %cst_30 = arith.constant dense<0.000000e+00> : vector<8x16xf32>
    %75 = tpu.matmul %73, %74, %cst_30 {dimension_numbers = #tpu.dot_dimension_numbers<[1], [1], [0], [0], [0, 0, 1, 0], [], []>} : vector<8x16xbf16>, vector<16x16xbf16>, vector<8x16xf32> -> vector<8x16xf32>
    %cst_31 = arith.constant dense<0xFF800000> : vector<8xf32>
    %76 = vector.multi_reduction <maximumf>, %75, %cst_31 [1] : vector<8x16xf32> to vector<8xf32>
    %77 = vector.shape_cast %76 : vector<8xf32> to vector<8x1xf32>
    %78 = vector.broadcast %77 : vector<8x1xf32> to vector<8x16xf32>
    %79 = arith.subf %75, %78 : vector<8x16xf32>
    %80 = math.exp %79 : vector<8x16xf32>
    %cst_32 = arith.constant dense<0.000000e+00> : vector<8xf32>
    %81 = vector.multi_reduction <add>, %80, %cst_32 [1] : vector<8x16xf32> to vector<8xf32>
    %82 = vector.shape_cast %81 : vector<8xf32> to vector<8x1xf32>
    %83 = vector.broadcast %82 : vector<8x1xf32> to vector<8x16xf32>
    %84 = arith.divf %80, %83 : vector<8x16xf32>
    %85 = arith.truncf %84 : vector<8x16xf32> to vector<8x16xbf16>
    %86 = vector.extract_strided_slice %24 {offsets = [0, 176], sizes = [16, 16], strides = [1, 1]} : vector<16x256xbf16> to vector<16x16xbf16>
    %cst_33 = arith.constant dense<0.000000e+00> : vector<8x16xf32>
    %87 = tpu.matmul %85, %86, %cst_33 {dimension_numbers = #tpu.dot_dimension_numbers<[1], [0], [0], [1], [0, 0, 1, 1], [], []>} : vector<8x16xbf16>, vector<16x16xbf16>, vector<8x16xf32> -> vector<8x16xf32>
    %c0_34 = arith.constant 0 : index
    %c48 = arith.constant 48 : index
    %88 = vector.load %arg12[%c0_34, %c48] : memref<8x128xf32, #tpu.memory_space<vmem>>, vector<8x16xf32>
    tpu.vector_store %arg12[%c0_34, %c48], %87 {strides = array<i32>} : memref<8x128xf32, #tpu.memory_space<vmem>>, vector<8x16xf32>,
    %89 = vector.extract_strided_slice %23 {offsets = [0, 64], sizes = [8, 16], strides = [1, 1]} : vector<8x128xbf16> to vector<8x16xbf16>
    %90 = vector.extract_strided_slice %24 {offsets = [0, 64], sizes = [16, 16], strides = [1, 1]} : vector<16x256xbf16> to vector<16x16xbf16>
    %cst_35 = arith.constant dense<0.000000e+00> : vector<8x16xf32>
    %91 = tpu.matmul %89, %90, %cst_35 {dimension_numbers = #tpu.dot_dimension_numbers<[1], [1], [0], [0], [0, 0, 1, 0], [], []>} : vector<8x16xbf16>, vector<16x16xbf16>, vector<8x16xf32> -> vector<8x16xf32>
    %cst_36 = arith.constant dense<0xFF800000> : vector<8xf32>
    %92 = vector.multi_reduction <maximumf>, %91, %cst_36 [1] : vector<8x16xf32> to vector<8xf32>
    %93 = vector.shape_cast %92 : vector<8xf32> to vector<8x1xf32>
    %94 = vector.broadcast %93 : vector<8x1xf32> to vector<8x16xf32>
    %95 = arith.subf %91, %94 : vector<8x16xf32>
    %96 = math.exp %95 : vector<8x16xf32>
    %cst_37 = arith.constant dense<0.000000e+00> : vector<8xf32>
    %97 = vector.multi_reduction <add>, %96, %cst_37 [1] : vector<8x16xf32> to vector<8xf32>
    %98 = vector.shape_cast %97 : vector<8xf32> to vector<8x1xf32>
    %99 = vector.broadcast %98 : vector<8x1xf32> to vector<8x16xf32>
    %100 = arith.divf %96, %99 : vector<8x16xf32>
    %101 = arith.truncf %100 : vector<8x16xf32> to vector<8x16xbf16>
    %102 = vector.extract_strided_slice %24 {offsets = [0, 192], sizes = [16, 16], strides = [1, 1]} : vector<16x256xbf16> to vector<16x16xbf16>
    %cst_38 = arith.constant dense<0.000000e+00> : vector<8x16xf32>
    %103 = tpu.matmul %101, %102, %cst_38 {dimension_numbers = #tpu.dot_dimension_numbers<[1], [0], [0], [1], [0, 0, 1, 1], [], []>} : vector<8x16xbf16>, vector<16x16xbf16>, vector<8x16xf32> -> vector<8x16xf32>
    %c0_39 = arith.constant 0 : index
    %c64 = arith.constant 64 : index
    %104 = vector.load %arg12[%c0_39, %c64] : memref<8x128xf32, #tpu.memory_space<vmem>>, vector<8x16xf32>
    tpu.vector_store %arg12[%c0_39, %c64], %103 {strides = array<i32>} : memref<8x128xf32, #tpu.memory_space<vmem>>, vector<8x16xf32>,
    %105 = vector.extract_strided_slice %23 {offsets = [0, 80], sizes = [8, 16], strides = [1, 1]} : vector<8x128xbf16> to vector<8x16xbf16>
    %106 = vector.extract_strided_slice %24 {offsets = [0, 80], sizes = [16, 16], strides = [1, 1]} : vector<16x256xbf16> to vector<16x16xbf16>
    %cst_40 = arith.constant dense<0.000000e+00> : vector<8x16xf32>
    %107 = tpu.matmul %105, %106, %cst_40 {dimension_numbers = #tpu.dot_dimension_numbers<[1], [1], [0], [0], [0, 0, 1, 0], [], []>} : vector<8x16xbf16>, vector<16x16xbf16>, vector<8x16xf32> -> vector<8x16xf32>
    %cst_41 = arith.constant dense<0xFF800000> : vector<8xf32>
    %108 = vector.multi_reduction <maximumf>, %107, %cst_41 [1] : vector<8x16xf32> to vector<8xf32>
    %109 = vector.shape_cast %108 : vector<8xf32> to vector<8x1xf32>
    %110 = vector.broadcast %109 : vector<8x1xf32> to vector<8x16xf32>
    %111 = arith.subf %107, %110 : vector<8x16xf32>
    %112 = math.exp %111 : vector<8x16xf32>
    %cst_42 = arith.constant dense<0.000000e+00> : vector<8xf32>
    %113 = vector.multi_reduction <add>, %112, %cst_42 [1] : vector<8x16xf32> to vector<8xf32>
    %114 = vector.shape_cast %113 : vector<8xf32> to vector<8x1xf32>
    %115 = vector.broadcast %114 : vector<8x1xf32> to vector<8x16xf32>
    %116 = arith.divf %112, %115 : vector<8x16xf32>
    %117 = arith.truncf %116 : vector<8x16xf32> to vector<8x16xbf16>
    %118 = vector.extract_strided_slice %24 {offsets = [0, 208], sizes = [16, 16], strides = [1, 1]} : vector<16x256xbf16> to vector<16x16xbf16>
    %cst_43 = arith.constant dense<0.000000e+00> : vector<8x16xf32>
    %119 = tpu.matmul %117, %118, %cst_43 {dimension_numbers = #tpu.dot_dimension_numbers<[1], [0], [0], [1], [0, 0, 1, 1], [], []>} : vector<8x16xbf16>, vector<16x16xbf16>, vector<8x16xf32> -> vector<8x16xf32>
    %c0_44 = arith.constant 0 : index
    %c80 = arith.constant 80 : index
    %120 = vector.load %arg12[%c0_44, %c80] : memref<8x128xf32, #tpu.memory_space<vmem>>, vector<8x16xf32>
    tpu.vector_store %arg12[%c0_44, %c80], %119 {strides = array<i32>} : memref<8x128xf32, #tpu.memory_space<vmem>>, vector<8x16xf32>,
    %121 = vector.extract_strided_slice %23 {offsets = [0, 96], sizes = [8, 16], strides = [1, 1]} : vector<8x128xbf16> to vector<8x16xbf16>
    %122 = vector.extract_strided_slice %24 {offsets = [0, 96], sizes = [16, 16], strides = [1, 1]} : vector<16x256xbf16> to vector<16x16xbf16>
    %cst_45 = arith.constant dense<0.000000e+00> : vector<8x16xf32>
    %123 = tpu.matmul %121, %122, %cst_45 {dimension_numbers = #tpu.dot_dimension_numbers<[1], [1], [0], [0], [0, 0, 1, 0], [], []>} : vector<8x16xbf16>, vector<16x16xbf16>, vector<8x16xf32> -> vector<8x16xf32>
    %cst_46 = arith.constant dense<0xFF800000> : vector<8xf32>
    %124 = vector.multi_reduction <maximumf>, %123, %cst_46 [1] : vector<8x16xf32> to vector<8xf32>
    %125 = vector.shape_cast %124 : vector<8xf32> to vector<8x1xf32>
    %126 = vector.broadcast %125 : vector<8x1xf32> to vector<8x16xf32>
    %127 = arith.subf %123, %126 : vector<8x16xf32>
    %128 = math.exp %127 : vector<8x16xf32>
    %cst_47 = arith.constant dense<0.000000e+00> : vector<8xf32>
    %129 = vector.multi_reduction <add>, %128, %cst_47 [1] : vector<8x16xf32> to vector<8xf32>
    %130 = vector.shape_cast %129 : vector<8xf32> to vector<8x1xf32>
    %131 = vector.broadcast %130 : vector<8x1xf32> to vector<8x16xf32>
    %132 = arith.divf %128, %131 : vector<8x16xf32>
    %133 = arith.truncf %132 : vector<8x16xf32> to vector<8x16xbf16>
    %134 = vector.extract_strided_slice %24 {offsets = [0, 224], sizes = [16, 16], strides = [1, 1]} : vector<16x256xbf16> to vector<16x16xbf16>
    %cst_48 = arith.constant dense<0.000000e+00> : vector<8x16xf32>
    %135 = tpu.matmul %133, %134, %cst_48 {dimension_numbers = #tpu.dot_dimension_numbers<[1], [0], [0], [1], [0, 0, 1, 1], [], []>} : vector<8x16xbf16>, vector<16x16xbf16>, vector<8x16xf32> -> vector<8x16xf32>
    %c0_49 = arith.constant 0 : index
    %c96 = arith.constant 96 : index
    %136 = vector.load %arg12[%c0_49, %c96] : memref<8x128xf32, #tpu.memory_space<vmem>>, vector<8x16xf32>
    tpu.vector_store %arg12[%c0_49, %c96], %135 {strides = array<i32>} : memref<8x128xf32, #tpu.memory_space<vmem>>, vector<8x16xf32>,
    %137 = vector.extract_strided_slice %23 {offsets = [0, 112], sizes = [8, 16], strides = [1, 1]} : vector<8x128xbf16> to vector<8x16xbf16>
    %138 = vector.extract_strided_slice %24 {offsets = [0, 112], sizes = [16, 16], strides = [1, 1]} : vector<16x256xbf16> to vector<16x16xbf16>
    %cst_50 = arith.constant dense<0.000000e+00> : vector<8x16xf32>
    %139 = tpu.matmul %137, %138, %cst_50 {dimension_numbers = #tpu.dot_dimension_numbers<[1], [1], [0], [0], [0, 0, 1, 0], [], []>} : vector<8x16xbf16>, vector<16x16xbf16>, vector<8x16xf32> -> vector<8x16xf32>
    %cst_51 = arith.constant dense<0xFF800000> : vector<8xf32>
    %140 = vector.multi_reduction <maximumf>, %139, %cst_51 [1] : vector<8x16xf32> to vector<8xf32>
    %141 = vector.shape_cast %140 : vector<8xf32> to vector<8x1xf32>
    %142 = vector.broadcast %141 : vector<8x1xf32> to vector<8x16xf32>
    %143 = arith.subf %139, %142 : vector<8x16xf32>
    %144 = math.exp %143 : vector<8x16xf32>
    %cst_52 = arith.constant dense<0.000000e+00> : vector<8xf32>
    %145 = vector.multi_reduction <add>, %144, %cst_52 [1] : vector<8x16xf32> to vector<8xf32>
    %146 = vector.shape_cast %145 : vector<8xf32> to vector<8x1xf32>
    %147 = vector.broadcast %146 : vector<8x1xf32> to vector<8x16xf32>
    %148 = arith.divf %144, %147 : vector<8x16xf32>
    %149 = arith.truncf %148 : vector<8x16xf32> to vector<8x16xbf16>
    %150 = vector.extract_strided_slice %24 {offsets = [0, 240], sizes = [16, 16], strides = [1, 1]} : vector<16x256xbf16> to vector<16x16xbf16>
    %cst_53 = arith.constant dense<0.000000e+00> : vector<8x16xf32>
    %151 = tpu.matmul %149, %150, %cst_53 {dimension_numbers = #tpu.dot_dimension_numbers<[1], [0], [0], [1], [0, 0, 1, 1], [], []>} : vector<8x16xbf16>, vector<16x16xbf16>, vector<8x16xf32> -> vector<8x16xf32>
    %c0_54 = arith.constant 0 : index
    %c112 = arith.constant 112 : index
    %152 = vector.load %arg12[%c0_54, %c112] : memref<8x128xf32, #tpu.memory_space<vmem>>, vector<8x16xf32>
    tpu.vector_store %arg12[%c0_54, %c112], %151 {strides = array<i32>} : memref<8x128xf32, #tpu.memory_space<vmem>>, vector<8x16xf32>,
    %c0_55 = arith.constant 0 : index
    %c0_56 = arith.constant 0 : index
    %153 = vector.load %arg12[%c0_55, %c0_56] : memref<8x128xf32, #tpu.memory_space<vmem>>, vector<8x128xf32>
    %154 = arith.truncf %153 : vector<8x128xf32> to vector<8x128xbf16>
    %c0_57 = arith.constant 0 : index
    %c0_58 = arith.constant 0 : index
    %155 = vector.load %arg5[%c0_57, %c0_58] : memref<128x128xbf16, #tpu.memory_space<vmem>>, vector<128x128xbf16>
    %cst_59 = arith.constant dense<0.000000e+00> : vector<8x128xf32>
    %156 = tpu.matmul %154, %155, %cst_59 {dimension_numbers = #tpu.dot_dimension_numbers<[1], [0], [0], [1], [0, 0, 1, 1], [], []>} : vector<8x128xbf16>, vector<128x128xbf16>, vector<8x128xf32> -> vector<8x128xf32>
    %157 = vector.broadcast %6 : vector<1x128xf32> to vector<8x128xf32>
    %158 = arith.addf %156, %157 : vector<8x128xf32>
    %159 = arith.addf %1, %158 : vector<8x128xf32>
    %cst_60 = arith.constant dense<0.000000e+00> : vector<8xf32>
    %160 = vector.multi_reduction <add>, %159, %cst_60 [1] : vector<8x128xf32> to vector<8xf32>
    %161 = vector.shape_cast %160 : vector<8xf32> to vector<8x1xf32>
    %cst_61 = arith.constant 1.280000e+02 : f32
    %162 = vector.broadcast %cst_61 : f32 to vector<8x1xf32>
    %163 = arith.divf %161, %162 : vector<8x1xf32>
    %164 = vector.broadcast %163 : vector<8x1xf32> to vector<8x128xf32>
    %165 = arith.subf %159, %164 : vector<8x128xf32>
    %166 = arith.mulf %165, %165 : vector<8x128xf32>
    %cst_62 = arith.constant dense<0.000000e+00> : vector<8xf32>
    %167 = vector.multi_reduction <add>, %166, %cst_62 [1] : vector<8x128xf32> to vector<8xf32>
    %168 = vector.shape_cast %167 : vector<8xf32> to vector<8x1xf32>
    %cst_63 = arith.constant 1.280000e+02 : f32
    %169 = vector.broadcast %cst_63 : f32 to vector<8x1xf32>
    %170 = arith.divf %168, %169 : vector<8x1xf32>
    %cst_64 = arith.constant 9.99999996E-13 : f32
    %171 = vector.broadcast %cst_64 : f32 to vector<8x1xf32>
    %172 = arith.addf %170, %171 : vector<8x1xf32>
    %173 = math.rsqrt %172 : vector<8x1xf32>
    %174 = vector.broadcast %173 : vector<8x1xf32> to vector<8x128xf32>
    %175 = arith.mulf %165, %174 : vector<8x128xf32>
    %176 = vector.broadcast %8 : vector<1x128xf32> to vector<8x128xf32>
    %177 = arith.mulf %175, %176 : vector<8x128xf32>
    %178 = vector.broadcast %9 : vector<1x128xf32> to vector<8x128xf32>
    %179 = arith.addf %177, %178 : vector<8x128xf32>
    %180 = arith.truncf %179 : vector<8x128xf32> to vector<8x128xbf16>
    %c0_65 = arith.constant 0 : index
    %c0_66 = arith.constant 0 : index
    %181 = vector.load %arg6[%c0_65, %c0_66] : memref<128x512xbf16, #tpu.memory_space<vmem>>, vector<128x512xbf16>
    %cst_67 = arith.constant dense<0.000000e+00> : vector<8x512xf32>
    %182 = tpu.matmul %180, %181, %cst_67 {dimension_numbers = #tpu.dot_dimension_numbers<[1], [0], [0], [1], [0, 0, 1, 1], [], []>} : vector<8x128xbf16>, vector<128x512xbf16>, vector<8x512xf32> -> vector<8x512xf32>
    %c0_68 = arith.constant 0 : index
    %c0_69 = arith.constant 0 : index
    %183 = vector.load %arg9[%c0_68, %c0_69] : memref<1x512xf32, #tpu.memory_space<vmem>>, vector<1x512xf32>
    %184 = vector.broadcast %183 : vector<1x512xf32> to vector<8x512xf32>
    %185 = arith.addf %182, %184 : vector<8x512xf32>
    %cst_70 = arith.constant 5.000000e-01 : f32
    %186 = vector.broadcast %cst_70 : f32 to vector<8x512xf32>
    %187 = arith.mulf %186, %185 : vector<8x512xf32>
    %cst_71 = arith.constant 0.707106769 : f32
    %188 = vector.broadcast %cst_71 : f32 to vector<8x512xf32>
    %189 = arith.mulf %185, %188 : vector<8x512xf32>
    %cst_72 = arith.constant 0.000000e+00 : f32
    %190 = vector.broadcast %cst_72 : f32 to vector<8x512xf32>
    %191 = arith.cmpf oge, %189, %190 : vector<8x512xf32>
    %cst_73 = arith.constant 1.000000e+00 : f32
    %cst_74 = arith.constant -1.000000e+00 : f32
    %192 = vector.broadcast %cst_73 : f32 to vector<8x512xf32>
    %193 = vector.broadcast %cst_74 : f32 to vector<8x512xf32>
    %194 = arith.select %191, %192, %193 : vector<8x512xi1>, vector<8x512xf32>
    %195 = math.absf %189 : vector<8x512xf32>
    %cst_75 = arith.constant 0.327591091 : f32
    %196 = vector.broadcast %cst_75 : f32 to vector<8x512xf32>
    %197 = arith.mulf %196, %195 : vector<8x512xf32>
    %cst_76 = arith.constant 1.000000e+00 : f32
    %198 = vector.broadcast %cst_76 : f32 to vector<8x512xf32>
    %199 = arith.addf %198, %197 : vector<8x512xf32>
    %cst_77 = arith.constant 1.000000e+00 : f32
    %200 = vector.broadcast %cst_77 : f32 to vector<8x512xf32>
    %201 = arith.divf %200, %199 : vector<8x512xf32>
    %cst_78 = arith.constant 1.06140542 : f32
    %202 = vector.broadcast %cst_78 : f32 to vector<8x512xf32>
    %203 = arith.mulf %202, %201 : vector<8x512xf32>
    %cst_79 = arith.constant -1.45315206 : f32
    %204 = vector.broadcast %cst_79 : f32 to vector<8x512xf32>
    %205 = arith.addf %203, %204 : vector<8x512xf32>
    %206 = arith.mulf %205, %201 : vector<8x512xf32>
    %cst_80 = arith.constant 1.42141378 : f32
    %207 = vector.broadcast %cst_80 : f32 to vector<8x512xf32>
    %208 = arith.addf %206, %207 : vector<8x512xf32>
    %209 = arith.mulf %208, %201 : vector<8x512xf32>
    %cst_81 = arith.constant -0.284496725 : f32
    %210 = vector.broadcast %cst_81 : f32 to vector<8x512xf32>
    %211 = arith.addf %209, %210 : vector<8x512xf32>
    %212 = arith.mulf %211, %201 : vector<8x512xf32>
    %cst_82 = arith.constant 0.254829586 : f32
    %213 = vector.broadcast %cst_82 : f32 to vector<8x512xf32>
    %214 = arith.addf %212, %213 : vector<8x512xf32>
    %215 = arith.mulf %214, %201 : vector<8x512xf32>
    %cst_83 = arith.constant 0.000000e+00 : f32
    %216 = vector.broadcast %cst_83 : f32 to vector<8x512xf32>
    %217 = arith.subf %216, %195 : vector<8x512xf32>
    %218 = arith.mulf %217, %195 : vector<8x512xf32>
    %219 = math.exp %218 : vector<8x512xf32>
    %220 = arith.mulf %215, %219 : vector<8x512xf32>
    %cst_84 = arith.constant 1.000000e+00 : f32
    %221 = vector.broadcast %cst_84 : f32 to vector<8x512xf32>
    %222 = arith.subf %221, %220 : vector<8x512xf32>
    %223 = arith.mulf %194, %222 : vector<8x512xf32>
    %cst_85 = arith.constant 1.000000e+00 : f32
    %224 = vector.broadcast %cst_85 : f32 to vector<8x512xf32>
    %225 = arith.addf %224, %223 : vector<8x512xf32>
    %226 = arith.mulf %187, %225 : vector<8x512xf32>
    %227 = arith.truncf %226 : vector<8x512xf32> to vector<8x512xbf16>
    %c0_86 = arith.constant 0 : index
    %c0_87 = arith.constant 0 : index
    %228 = vector.load %arg7[%c0_86, %c0_87] : memref<512x128xbf16, #tpu.memory_space<vmem>>, vector<512x128xbf16>
    %cst_88 = arith.constant dense<0.000000e+00> : vector<8x128xf32>
    %229 = tpu.matmul %227, %228, %cst_88 {dimension_numbers = #tpu.dot_dimension_numbers<[1], [0], [0], [1], [0, 0, 1, 1], [], []>} : vector<8x512xbf16>, vector<512x128xbf16>, vector<8x128xf32> -> vector<8x128xf32>
    %230 = vector.broadcast %7 : vector<1x128xf32> to vector<8x128xf32>
    %231 = arith.addf %229, %230 : vector<8x128xf32>
    %232 = arith.addf %179, %231 : vector<8x128xf32>
    %cst_89 = arith.constant dense<0.000000e+00> : vector<8xf32>
    %233 = vector.multi_reduction <add>, %232, %cst_89 [1] : vector<8x128xf32> to vector<8xf32>
    %234 = vector.shape_cast %233 : vector<8xf32> to vector<8x1xf32>
    %cst_90 = arith.constant 1.280000e+02 : f32
    %235 = vector.broadcast %cst_90 : f32 to vector<8x1xf32>
    %236 = arith.divf %234, %235 : vector<8x1xf32>
    %237 = vector.broadcast %236 : vector<8x1xf32> to vector<8x128xf32>
    %238 = arith.subf %232, %237 : vector<8x128xf32>
    %239 = arith.mulf %238, %238 : vector<8x128xf32>
    %cst_91 = arith.constant dense<0.000000e+00> : vector<8xf32>
    %240 = vector.multi_reduction <add>, %239, %cst_91 [1] : vector<8x128xf32> to vector<8xf32>
    %241 = vector.shape_cast %240 : vector<8xf32> to vector<8x1xf32>
    %cst_92 = arith.constant 1.280000e+02 : f32
    %242 = vector.broadcast %cst_92 : f32 to vector<8x1xf32>
    %243 = arith.divf %241, %242 : vector<8x1xf32>
    %cst_93 = arith.constant 9.99999996E-13 : f32
    %244 = vector.broadcast %cst_93 : f32 to vector<8x1xf32>
    %245 = arith.addf %243, %244 : vector<8x1xf32>
    %246 = math.rsqrt %245 : vector<8x1xf32>
    %247 = vector.broadcast %246 : vector<8x1xf32> to vector<8x128xf32>
    %248 = arith.mulf %238, %247 : vector<8x128xf32>
    %249 = vector.broadcast %10 : vector<1x128xf32> to vector<8x128xf32>
    %250 = arith.mulf %248, %249 : vector<8x128xf32>
    %251 = vector.broadcast %11 : vector<1x128xf32> to vector<8x128xf32>
    %252 = arith.addf %250, %251 : vector<8x128xf32>
    %c0_94 = arith.constant 0 : index
    %c0_95 = arith.constant 0 : index
    %c0_96 = arith.constant 0 : index
    %253 = vector.load %arg11[%c0_94, %c0_95, %c0_96] : memref<1x8x128xf32, #tpu.memory_space<vmem>>, vector<1x8x128xf32>
    %254 = vector.shape_cast %253 : vector<1x8x128xf32> to vector<8x128xf32>
    %255 = vector.shape_cast %252 : vector<8x128xf32> to vector<1x8x128xf32>
    tpu.vector_store %arg11[%c0_94, %c0_95, %c0_96], %255 {strides = array<i32>} : memref<1x8x128xf32, #tpu.memory_space<vmem>>, vector<1x8x128xf32>,
    return
  }
  func.func @transform_0(%arg0: i32) -> (i32, i32, i32) {
    %c0_i32 = arith.constant 0 : i32
    %c0_i32_0 = arith.constant 0 : i32
    %c0_i32_1 = arith.constant 0 : i32
    return %arg0, %c0_i32, %c0_i32_0 : i32, i32, i32
  }
  func.func @transform_1(%arg0: i32) -> (i32, i32, i32) {
    %c0_i32 = arith.constant 0 : i32
    %c0_i32_0 = arith.constant 0 : i32
    %c0_i32_1 = arith.constant 0 : i32
    return %arg0, %c0_i32, %c0_i32_0 : i32, i32, i32
  }
  func.func @transform_2(%arg0: i32) -> (i32, i32) {
    %c0_i32 = arith.constant 0 : i32
    %c0_i32_0 = arith.constant 0 : i32
    %c0_i32_1 = arith.constant 0 : i32
    return %c0_i32, %c0_i32_0 : i32, i32
  }
  func.func @transform_3(%arg0: i32) -> (i32, i32) {
    %c0_i32 = arith.constant 0 : i32
    %c0_i32_0 = arith.constant 0 : i32
    %c0_i32_1 = arith.constant 0 : i32
    return %c0_i32, %c0_i32_0 : i32, i32
  }
  func.func @transform_4(%arg0: i32) -> (i32, i32) {
    %c0_i32 = arith.constant 0 : i32
    %c0_i32_0 = arith.constant 0 : i32
    %c0_i32_1 = arith.constant 0 : i32
    return %c0_i32, %c0_i32_0 : i32, i32
  }
  func.func @transform_5(%arg0: i32) -> (i32, i32) {
    %c0_i32 = arith.constant 0 : i32
    %c0_i32_0 = arith.constant 0 : i32
    %c0_i32_1 = arith.constant 0 : i32
    return %c0_i32, %c0_i32_0 : i32, i32
  }
  func.func @transform_6(%arg0: i32) -> (i32, i32) {
    %c0_i32 = arith.constant 0 : i32
    %c0_i32_0 = arith.constant 0 : i32
    %c0_i32_1 = arith.constant 0 : i32
    return %c0_i32, %c0_i32_0 : i32, i32
  }
  func.func @transform_7(%arg0: i32) -> (i32, i32) {
    %c0_i32 = arith.constant 0 : i32
    %c0_i32_0 = arith.constant 0 : i32
    %c0_i32_1 = arith.constant 0 : i32
    return %c0_i32, %c0_i32_0 : i32, i32
  }
  func.func @transform_8(%arg0: i32) -> (i32, i32) {
    %c0_i32 = arith.constant 0 : i32
    %c0_i32_0 = arith.constant 0 : i32
    %c0_i32_1 = arith.constant 0 : i32
    return %c0_i32, %c0_i32_0 : i32, i32
  }
  func.func @transform_9(%arg0: i32) -> (i32, i32) {
    %c0_i32 = arith.constant 0 : i32
    %c0_i32_0 = arith.constant 0 : i32
    %c0_i32_1 = arith.constant 0 : i32
    return %c0_i32, %c0_i32_0 : i32, i32
  }
  func.func @transform_10(%arg0: i32) -> (i32, i32, i32) {
    %c0_i32 = arith.constant 0 : i32
    %c0_i32_0 = arith.constant 0 : i32
    %c0_i32_1 = arith.constant 0 : i32
    return %arg0, %c0_i32, %c0_i32_0 : i32, i32, i32
  }
}

</mosaic_0001>

<bundles_post_ra>
// kernel: decoder_forward.1
= control target key start
LH: loop header
LB: loop body
LE: loop exit
PB: predicated region body
PF: predicated region fallthrough
CT: control target
= control target key end

     0   :  { %15 = vsyncpa [#allocation4], 0  ;;  %s3868_s0 = inlined_call_operand.vmem [shape: f32[2,8,128], index: 0, kind: input, shape index: {}]   ;;  %s3869_s1 = inlined_call_operand.vmem [shape: f32[2,16,128], index: 1, kind: input, shape index: {}]   ;;  %s3870_s2 = inlined_call_operand.vmem [shape: bf16[128,128], index: 2, kind: input, shape index: {}]   ;;  %s3871_s3 = inlined_call_operand.hbm [shape: bf16[128,256], index: 3, kind: input, shape index: {}]   ;;  %s3872_s4 = inlined_call_operand.hbm [shape: bf16[128,128], index: 4, kind: input, shape index: {}]   ;;  %s3873_s5 = inlined_call_operand.hbm [shape: bf16[128,512], index: 5, kind: input, shape index: {}]   ;;  %s3874_s6 = inlined_call_operand.hbm [shape: bf16[512,128], index: 6, kind: input, shape index: {}]   ;;  %s3875_s7 = inlined_call_operand.vmem [shape: f32[1,256], index: 7, kind: input, shape index: {}]   ;;  %s3876_s8 = inlined_call_operand.vmem [shape: f32[1,512], index: 8, kind: input, shape index: {}]   ;;  %s3877_s9 = inlined_call_operand.vmem [shape: f32[8,128], index: 9, kind: input, shape index: {}]   ;;  %s3878_s10 = inlined_call_operand.vmem [shape: f32[2,8,128], index: 10, kind: output, shape index: {}]  }
   0x1   :  { %16 = vsyncpa [#allocation6], 0 }
   0x2   :  { %17 = vsyncpa [#allocation9], 0  ;;  %s3427_s13 = smov 0  }
   0x3 LB: > { %s3351_s14 = smov [#allocation5]   ;;  %s3433_s16 = sadd.s32 4294967295, %s3349_s13   ;;  %s3349_s13 = sphi %s3427_s13, %s23_s13  }
   0x4   : > { %s302_s15 = sshll.u32 %s3351_s14, 4  ;;  %p2620_p0 = scmp.ge.s32.totalorder %s3349_s13, 1  ;;  %s3438_s15 = int_to_ptr.vmem [resolvable:$true] %s302_s15 }
   0x5   : > { %p274_p1 = scmp.lt.s32.totalorder %s3349_s13, 3  ;;  %p3879_p2 = scmp.eq.s32.totalorder %s3433_s16, 0 }
   0x6   : > { %s3352_s18 = smov [#allocation3]   ;;  %s3353_s21 = smov [#allocation7]  }
   0x7   : > { %p3440_p3 = pnand %p2620_p0, %p274_p1  ;;  %s289_s19 = sshll.u32 %s3352_s18, 4  ;;  %s3446_s19 = int_to_ptr.vmem [resolvable:$true] %s289_s19 }
   0x8   : > { %s3454_s22 = sshll.u32 %s3353_s21, 4  ;;  %s3219_s25 = scalar_lea.hbm %s3872_s4, 1024  ;;  %s316_s22 = int_to_ptr.vmem [resolvable:$true] %s3454_s22 }
   0x9   : > { %s3882_s17 = scalar_select %p3440_p3, 1, 0 }
   0xa   : > { %p2996_p4 = pneg %p3440_p3  ;;  %p3220_p6 = scmp.ne.s32.totalorder %s3872_s4, %s3219_s25 }
   0xb   : > { %p3226_p10 = scmp.lt.u32.totalorder %s3219_s25, %s3872_s4 }
   0xc   : > { %p3450_p5 = pnand %p3879_p2, %p2996_p4 }
   0xe   : > { %p3464_p7 = pneg %p3450_p5 }
  0x10   : > { %p3222_p8 = pnand %p3464_p7, %p3220_p6 }
  0x12   : > { %p3223_p9 = pneg %p3222_p8 }
  0x14   : > { %p3228_p11 = pnand %p3226_p10, %p3223_p9 }
  0x16   : > { %3231 = shalt.err (!%p3228_p11)
}
  0x17   : > { %s3232_s11 = scalar_lea.vmem %s3438_s15, 1024  ;;  %p3240_p1 = scmp.lt.s32.totalorder %s3438_s15, %s3438_s15 }
  0x18   : > { %p3233_p12 = scmp.ne.s32.totalorder %s3438_s15, %s3232_s11  ;;  %p3241_p4 = scmp.lt.s32.totalorder %s3232_s11, %s3232_s11 }
  0x1a   : > { %p3235_p13 = pnand %p3233_p12, %p3464_p7  ;;  %p3242_p6 = por %p3241_p4, %p3240_p1 }
  0x1c   : > { %p3236_p0 = pneg %p3235_p13 }
  0x1e   : > { %p3243_p8 = pnand %p3242_p6, %p3236_p0 }
  0x20   : > { %3246 = shalt.err (!%p3243_p8)
}
  0x21   : > { %s3881_s12 = smov 64   ;;  %s3355_s14 = smov 4  }
  0x22   : > { %3002 = dma.hbm_to_vmem [thread:$0]  (!%p3450_p5), %s3872_s4, 1024, %s3438_s15, [#allocation6], %s3881_s12, %s3881_s12, %s3355_s14  }
  0x23   : > { %s3247_s25 = scalar_lea.hbm %s3871_s3, 2048 }
  0x24   : > { %p3248_p9 = scmp.ne.s32.totalorder %s3871_s3, %s3247_s25  ;;  %p3254_p12 = scmp.lt.u32.totalorder %s3247_s25, %s3871_s3 }
  0x26   : > { %p3250_p10 = pnand %p3248_p9, %p3464_p7 }
  0x28   : > { %p3251_p11 = pneg %p3250_p10 }
  0x2a   : > { %p3256_p13 = pnand %p3254_p12, %p3251_p11 }
  0x2c   : > { %3259 = shalt.err (!%p3256_p13)
}
  0x2d   : > { %s3260_s15 = scalar_lea.vmem %s3446_s19, 2048  ;;  %p3268_p6 = scmp.lt.s32.totalorder %s3446_s19, %s3446_s19 }
  0x2e   : > { %p3261_p0 = scmp.ne.s32.totalorder %s3446_s19, %s3260_s15  ;;  %p3269_p8 = scmp.lt.s32.totalorder %s3260_s15, %s3260_s15 }
  0x30   : > { %p3263_p1 = pnand %p3261_p0, %p3464_p7  ;;  %p3270_p9 = por %p3269_p8, %p3268_p6 }
  0x32   : > { %p3264_p4 = pneg %p3263_p1 }
  0x34   : > { %p3271_p10 = pnand %p3270_p9, %p3264_p4 }
  0x36   : > { %3274 = shalt.err (!%p3271_p10)
}
  0x37   : > { %s3356_s11 = smov 128   ;;  %s3357_s18 = smov 8  }
  0x38   : > { %2999 = dma.hbm_to_vmem [thread:$0]  (!%p3450_p5), %s3871_s3, 2048, %s3446_s19, [#allocation4], %s3356_s11, %s3356_s11, %s3357_s18  }
  0x39   : > { %s3275_s26 = scalar_lea.hbm %s3873_s5, 4096 }
  0x3a   : > { %p3276_p11 = scmp.ne.s32.totalorder %s3873_s5, %s3275_s26  ;;  %p3282_p0 = scmp.lt.u32.totalorder %s3275_s26, %s3873_s5 }
  0x3c   : > { %p3278_p12 = pnand %p3276_p11, %p3464_p7 }
  0x3e   : > { %p3279_p13 = pneg %p3278_p12 }
  0x40   : > { %p3284_p1 = pnand %p3282_p0, %p3279_p13 }
  0x42   : > { %3287 = shalt.err (!%p3284_p1)
}
  0x43   : > { %s3288_s21 = scalar_lea.vmem %s316_s22, 4096  ;;  %p3296_p9 = scmp.lt.s32.totalorder %s316_s22, %s316_s22 }
  0x44   : > { %p3289_p4 = scmp.ne.s32.totalorder %s316_s22, %s3288_s21  ;;  %p3297_p10 = scmp.lt.s32.totalorder %s3288_s21, %s3288_s21 }
  0x46   : > { %p3291_p6 = pnand %p3289_p4, %p3464_p7  ;;  %p3298_p2 = por %p3297_p10, %p3296_p9 }
  0x48   : > { %p3292_p8 = pneg %p3291_p6 }
  0x4a   : > { %p3299_p3 = pnand %p3298_p2, %p3292_p8 }
  0x4c   : > { %3302 = shalt.err (!%p3299_p3)
}
  0x4d   : > { %s3358_s19 = smov 256   ;;  %s3359_s11 = smov 16  }
  0x4e   : > { %3005 = dma.hbm_to_vmem [thread:$0]  (!%p3450_p5), %s3873_s5, 4096, %s316_s22, [#allocation6], %s3358_s19, %s3358_s19, %s3359_s11  }
  0x4f   : > { %s3360_s24 = smov [#allocation8]   ;;  %s3303_s29 = scalar_lea.hbm %s3874_s6, 4096 }
  0x50   : > { %s328_s25 = sshll.u32 %s3360_s24, 4  ;;  %p3304_p2 = scmp.ne.s32.totalorder %s3874_s6, %s3303_s29  ;;  %s329_s25 = int_to_ptr.vmem [resolvable:$true] %s328_s25 }
  0x51   : > { %p3310_p12 = scmp.lt.u32.totalorder %s3303_s29, %s3874_s6 }
  0x52   : > { %p3306_p3 = pnand %p3304_p2, %p3464_p7 }
  0x54   : > { %p3307_p11 = pneg %p3306_p3 }
  0x56   : > { %p3312_p13 = pnand %p3310_p12, %p3307_p11 }
  0x58   : > { %3315 = shalt.err (!%p3312_p13)
}
  0x59   : > { %s3316_s22 = scalar_lea.vmem %s329_s25, 4096  ;;  %p3324_p6 = scmp.lt.s32.totalorder %s329_s25, %s329_s25 }
  0x5a   : > { %p3317_p0 = scmp.ne.s32.totalorder %s329_s25, %s3316_s22  ;;  %p3325_p8 = scmp.lt.s32.totalorder %s3316_s22, %s3316_s22 }
  0x5c   : > { %p3319_p1 = pnand %p3317_p0, %p3464_p7  ;;  %p3326_p9 = por %p3325_p8, %p3324_p6 }
  0x5e   : > { %p3320_p4 = pneg %p3319_p1 }
  0x60   : > { %p3327_p10 = pnand %p3326_p9, %p3320_p4 }
  0x62   : > { %3330 = shalt.err (!%p3327_p10)
}
  0x63   : > { %s3885_s19 = smov 64   ;;  %p3886_p2 = scmp.ne.s32.totalorder %s3882_s17, 0 }
  0x64   : > { %3008 = dma.hbm_to_vmem [thread:$0]  (!%p3450_p5), %s3874_s6, 4096, %s329_s25, [#allocation9], %s3885_s19, %s3885_s19, %s3355_s14  }
  0x65   : > { %368 = sbr.rel (%p3886_p2) target bundleno = 3183 (0xc6f), region = 60  ;;  %p3887_p7 = scmp.eq.s32.totalorder (!%p3886_p2), %s3433_s16, 0 }
  0x6c   : > { %3336 = dma.done.wait (%p3887_p7), [#allocation4], 2048   ;;  %p3888_p3 = pmov %p3887_p7 }
  0x6e   : > { %3338 = vsyncadd (%p3888_p3), [#allocation4], 4294965248  ;;  %p3889_p11 = pmov %p3888_p3 }
  0x6f   : > { %p3890_p12 = pmov %p3888_p3 }
  0x70   : > { %3340 = dma.done.wait (%p3889_p11), [#allocation6], 5120  }
  0x71   : > { %3342 = vsyncadd (%p3890_p12), [#allocation6], 4294962176  ;;  %p3891_p13 = pmov %p3888_p3 }
  0x72   : > { %p3892_p5 = pmov %p3888_p3 }
  0x73   : > { %3344 = dma.done.wait (%p3891_p13), [#allocation9], 4096  }
  0x74   : > { %3346 = vsyncadd (%p3892_p5), [#allocation9], 4294963200  ;;  %v3361_v0 = vmov 0.0   ;;  %v3362_v1 = vmov 0   ;;  %vm3363_vm0 = vmmov 0   ;;  %v3052_v6 = vld [vmem:[%s3870_s2] sm:$0xff]   ;;  %v456_v31 = vlaneseq }
  0x75   : > { %2844 = vmatprep.subr.bf16.mxu0 %v3361_v0  ;;  %689 = vmatprep.mubr.bf16.mxu1 %v3362_v1  ;;  %v3046_v2 = vld [vmem:[#allocation3 + $0x4] ss:$8 sps:$4 sm:$0xff]   ;;  %v3048_v3 = vld [vmem:[#allocation3] ss:$8 sps:$4 sm:$0xff]   ;;  %v3049_v4 = vld [vmem:[#allocation3 + $0x14] ss:$8 sps:$4 sm:$0xff]  }
  0x76   : > { %2860 = vmatprep.mubr.msk.bf16.mxu0 %vm3363_vm0, %v3361_v0  ;;  %657 = vmatprep.subr.bf16.mxu1 %v3046_v2  ;;  %v3051_v5 = vld [vmem:[#allocation3 + $0x10] ss:$8 sps:$4 sm:$0xff]   ;;  %v3053_v7 = vld [vmem:[#allocation3 + $0x24] ss:$8 sps:$4 sm:$0xff]   ;;  %v3055_v9 = vld [vmem:[#allocation3 + $0x20] ss:$8 sps:$4 sm:$0xff]  }
  0x77   : > { %658 = vmatpush1.bf16.msra.mxu1 %v3048_v3  ;;  %2845 = vmatpush3.bf16.msra.mxu0 %v3052_v6  ;;  %v3056_v8 = vld [vmem:[%s3870_s2 + $0x8] sm:$0xff]   ;;  %v3057_v10 = vld [vmem:[#allocation3 + $0x34] ss:$8 sps:$4 sm:$0xff]   ;;  %v3060_v11 = vld [vmem:[%s3870_s2 + $0x10] sm:$0xff]   ;;  %p421_p0 = scmp.lt.s32.totalorder %s3433_s16, 1  ;;  %v3624_v32 = vshrl.u32 %v456_v31, 7 }
  0x78   : > { %659 = vmatprep.subr.bf16.mxu1 %v3049_v4  ;;  %2846 = vmatprep.subr.bf16.mxu0 %v3361_v0  ;;  %v3059_v12 = vld [vmem:[#allocation3 + $0x30] ss:$8 sps:$4 sm:$0xff]   ;;  %v3061_v13 = vld [vmem:[#allocation3 + $0x44] ss:$8 sps:$4 sm:$0xff]   ;;  %v3063_v15 = vld [vmem:[#allocation3 + $0x40] ss:$8 sps:$4 sm:$0xff]  }
  0x79   : > { %v3064_v14 = vld [vmem:[%s3870_s2 + $0x18] sm:$0xff]   ;;  %s3894_s16 = smov (!%p421_p0, %s3433_s16), 1  ;;  %v3068_v17 = vld [vmem:[%s3870_s2 + $0x20] sm:$0xff]   ;;  %v3069_v19 = vld [vmem:[#allocation3 + $0x64] ss:$8 sps:$4 sm:$0xff]   ;;  %v3627_v33 = vsub.s32 0, %v3624_v32 }
  0x7a   : > { %v3065_v16 = vld [vmem:[#allocation3 + $0x54] ss:$8 sps:$4 sm:$0xff]   ;;  %s2749_s29 = sshll.u32 %s3894_s16, 4  ;;  %v3067_v18 = vld [vmem:[#allocation3 + $0x50] ss:$8 sps:$4 sm:$0xff]   ;;  %v3072_v20 = vld [vmem:[%s3870_s2 + $0x28] sm:$0xff]  }
  0x7b   : > { %660 = vmatpush1.bf16.msra.mxu1 %v3051_v5  ;;  %2847 = vmatpush3.bf16.msra.mxu0 %v3056_v8  ;;  %s2631_s21 = sshll.u32 %s3894_s16, 3  ;;  %v3071_v21 = vld [vmem:[#allocation3 + $0x60] ss:$8 sps:$4 sm:$0xff]   ;;  %v3073_v22 = vld [vmem:[#allocation3 + $0x74] ss:$8 sps:$4 sm:$0xff]   ;;  %s429_s12 = scalar_lea.vmem %s3869_s1, %s2749_s29  ;;  %v3633_v35 = vsub.s32 1, %v3624_v32 }
  0x7c   : > { %661 = vmatprep.subr.bf16.mxu1 %v3053_v7  ;;  %2848 = vmatprep.subr.bf16.mxu0 %v3361_v0  ;;  %v3076_v23 = vld [vmem:[%s3870_s2 + $0x30] sm:$0xff]   ;;  %s424_s14 = scalar_lea.vmem %s3868_s0, %s2631_s21  ;;  %v3075_v24 = vld [vmem:[#allocation3 + $0x70] ss:$8 sps:$4 sm:$0xff]   ;;  %v437_v26 = vld [vmem:[%s429_s12 + $0x8] sm:$0xff]  ;;  %vm703_vm1 = vcmask 130048   ;;  %s3364_s29 = smov 112  }
  0x7d   : > { %v436_v25 = vld [vmem:[%s429_s12] sm:$0xff]  ;;  %v3077_v27 = vld [vmem:[%s3870_s2 + $0x38] sm:$0xff]   ;;  %s3365_s30 = smov 96   ;;  %s3366_s15 = smov 80   ;;  %vm921_vm2 = vcmask 261248   ;;  %vm1035_vm3 = vcmask 392448  }
  0x7e   : > { %v3613_v28 = vld [vmem:[%s424_s14] sm:$0xff]  ;;  %v548_v29 = vpack.c.bf16 %v437_v26, %v436_v25  ;;  %s3367_s22 = smov 64   ;;  %s3368_s19 = smov 48   ;;  %vm1149_vm4 = vcmask 523648   ;;  %vm1263_vm5 = vcmask 654848   ;;  %vm1377_vm6 = vcmask 786048  }
  0x7f   : > { %662 = vmatpush1.bf16.msra.mxu1 %v3055_v9  ;;  %2849 = vmatpush3.bf16.msra.mxu0 %v3060_v11  ;;  %v439_v30 = vpack.c.bf16 %v3613_v28, %v3613_v28  ;;  %v565_v34 = vld [vmem:[%s3875_s7] sm:$0x3]  ;;  %s3369_s12 = smov 32   ;;  %s3370_s11 = smov 16   ;;  %vm1491_vm7 = vcmask 917248   ;;  %vm1605_vm8 = vcmask 1048448  }
  0x80   : > { %663 = vmatprep.subr.bf16.mxu1 %v3057_v10  ;;  %2850 = vmatprep.subr.bf16.mxu0 %v3361_v0  ;;  %v3638_v36 = vld [vmem:[%s3877_s9] sm:$0xff]  ;;  %v570_v37 = vrot.slane %v565_v34, %v3627_v33  ;;  %v574_v40 = vrot.slane %v565_v34, %v3633_v35  ;;  %s433_s24 = scalar_lea.vmem %s3878_s10, %s2631_s21 }
  0x81   : > { %v459_v38 = vrot.slane %v3638_v36, %v3627_v33 }
  0x83   : > { %664 = vmatpush1.bf16.msra.mxu1 %v3059_v12  ;;  %2851 = vmatpush3.bf16.msra.mxu0 %v3064_v14 }
  0x84   : > { %665 = vmatprep.subr.bf16.mxu1 %v3061_v13  ;;  %2852 = vmatprep.subr.bf16.mxu0 %v3361_v0 }
  0x87   : > { %666 = vmatpush1.bf16.msra.mxu1 %v3063_v15  ;;  %2853 = vmatpush3.bf16.msra.mxu0 %v3068_v17 }
  0x88   : > { %667 = vmatprep.subr.bf16.mxu1 %v3065_v16  ;;  %2854 = vmatprep.subr.bf16.mxu0 %v3361_v0 }
  0x8b   : > { %668 = vmatpush1.bf16.msra.mxu1 %v3067_v18  ;;  %2855 = vmatpush3.bf16.msra.mxu0 %v3072_v20 }
  0x8c   : > { %669 = vmatprep.subr.bf16.mxu1 %v3069_v19  ;;  %2856 = vmatprep.subr.bf16.mxu0 %v3361_v0 }
  0x8f   : > { %670 = vmatpush1.bf16.msra.mxu1 %v3071_v21  ;;  %2857 = vmatpush3.bf16.msra.mxu0 %v3076_v23 }
  0x90   : > { %671 = vmatprep.subr.bf16.mxu1 %v3073_v22  ;;  %2858 = vmatprep.subr.bf16.mxu0 %v3361_v0 }
  0x93   : > { %672 = vmatpush1.bf16.msra.mxu1 %v3075_v24  ;;  %2859 = vmatpush3.bf16.msra.mxu0 %v3077_v27 }
  0x94   : > { %2864 = vmatprep.subr.bf16.mxu1 %v3361_v0  ;;  %2888 = vmatprep.subr.bf16.mxu0 %v3361_v0 }
  0x96   : > { %690 = vmatmul.mubr.bf16.vlgmr.msra.gmra.mrb[0].mxu1 %v548_v29  ;;  %2861 = vmatmul.mubr.bf16.vlgmr.msra.gmra.mrb[0].mxu0 %v439_v30 }
  0x97   : > { %2866 = vmatprep.mubr.msk.bf16.mxu1 %vm3363_vm0, %v3361_v0  ;;  %2890 = vmatprep.mubr.msk.bf16.mxu0 %vm3363_vm0, %v3361_v0 }
 0x169   : > { %v691_v39 = vpop.f32.mrb[0].mxu1  ;;  %v542_v43 = vpop.f32.mrb[0].mxu0 }
 0x16a   : > { %v693_v41 = vpop.f32.mrb[1].mxu1  ;;  %v692_v44 = vadd.f32 %v691_v39, %v570_v37  ;;  %v543_v47 = vadd.f32 %v542_v43, %v459_v38  ;;  %v2862_v48 = vpop.f32.mrb[1].mxu0 }
 0x16b   : > { %v695_v42 = vpop.f32.mrb[2].mxu1  ;;  %v694_v49 = vadd.f32 %v693_v41, %v574_v40  ;;  %v545_v51 = vpop.f32.mrb[2].mxu0 }
 0x16c   : > { %v696_v45 = vadd.f32 %v695_v42, %v570_v37  ;;  %v697_v46 = vpop.f32.mrb[3].mxu1  ;;  %v2863_v53 = vpop.f32.mrb[3].mxu0  ;;  %v700_v55 = vpack.c.bf16 %v543_v47, %v543_v47 }
 0x16d   : > { %v698_v50 = vadd.f32 %v697_v46, %v574_v40 }
 0x16e   : > { %v701_v52 = vpack.c.bf16 %v696_v45, %v692_v44 }
 0x16f   : > { %v3644_v54 = vpack.c.bf16 %v698_v50, %v694_v49 }
 0x170   : > { %810 = vrot.lane.b32.xlu1 %v701_v52, %s3364_s29  ;;  %v708_v56 = vsel %vm703_vm1, %v701_v52, 0 }
 0x171   : > { %2865 = vmatpush3.bf16.xpose.msra.mxu1 %v708_v56 }
 0x172   : > { %2870 = vmatprep.subr.bf16.mxu1 %v3361_v0 }
 0x174   : > { %807 = vrot.lane.b32.xlu1 %v700_v55, %s3364_s29 }
 0x178   : > { %923 = vrot.lane.b32.xlu1 %v700_v55, %s3365_s30  ;;  %2867 = vmatmul.mubr.msk.bf16.vlgmr.msra.gmra.mrb[4].mxu1 %vm703_vm1, %v700_v55 }
 0x179   : > { %2871 = vmatpush3.bf16.msra.mxu1 %v3644_v54  ;;  %2872 = vmatprep.mubr.msk.bf16.mxu1 %vm3363_vm0, %v3361_v0 }
 0x17a   : > { %2876 = vmatprep.subr.bf16.mxu1 %v3361_v0 }
 0x17c   : > { %1039 = vrot.lane.b32.xlu1 %v701_v52, %s3366_s15 }
 0x180   : > { %1037 = vrot.lane.b32.xlu1 %v700_v55, %s3366_s15 }
 0x184   : > { %1153 = vrot.lane.b32.xlu1 %v701_v52, %s3367_s22 }
 0x188   : > { %1151 = vrot.lane.b32.xlu1 %v700_v55, %s3367_s22 }
 0x18c   : > { %1267 = vrot.lane.b32.xlu1 %v701_v52, %s3368_s19 }
 0x190   : > { %1381 = vrot.lane.b32.xlu1 %v701_v52, %s3369_s12 }
 0x194   : > { %1495 = vrot.lane.b32.xlu1 %v701_v52, %s3370_s11 }
 0x1e2   : > { %v811_v5 = vpop.permute.xlu1 %810 }
 0x1e3   : > { %v816_v18 = vsel %vm703_vm1, %v811_v5, 0 }
 0x1e6   : > { %v808_v6 = vpop.permute.xlu1 %807 }
 0x1ea   : > { %v924_v7 = vpop.permute.xlu1 %923 }
 0x1ee   : > { %v1040_v9 = vpop.permute.xlu1 %1039 }
 0x1ef   : > { %v1045_v15 = vsel %vm703_vm1, %v1040_v9, 0 }
 0x1f2   : > { %v1038_v12 = vpop.permute.xlu1 %1037 }
 0x1f6   : > { %v1154_v16 = vpop.permute.xlu1 %1153 }
 0x1f7   : > { %v1159_v20 = vsel %vm703_vm1, %v1154_v16, 0 }
 0x1fa   : > { %v1152_v19 = vpop.permute.xlu1 %1151 }
 0x1fe   : > { %v1268_v21 = vpop.permute.xlu1 %1267 }
 0x1ff   : > { %v1273_v22 = vsel %vm703_vm1, %v1268_v21, 0 }
 0x202   : > { %v1382_v23 = vpop.permute.xlu1 %1381 }
 0x203   : > { %v1387_v25 = vsel %vm703_vm1, %v1382_v23, 0 }
 0x206   : > { %v1496_v26 = vpop.permute.xlu1 %1495 }
 0x207   : > { %v1501_v29 = vsel %vm703_vm1, %v1496_v26, 0 }
 0x24b   : > { %v744_v57 = vpop.f32.mrb[4].mxu1 }
 0x24c   : > { %v2868_v58 = vpop.f32.mrb[5].mxu1  ;;  %v750_v59 = vsel %vm703_vm1, %v744_v57, -inf }
 0x24d   : > { %751 = vmax.xlane.f32.xlu0 %v750_v59  ;;  %v747_v60 = vpop.f32.mrb[6].mxu1 }
 0x24e   : > { %v2869_v61 = vpop.f32.mrb[7].mxu1 }
 0x2da   : > { %v752_v62 = vpop.xlane.xlu0 %751 }
 0x2db   : > { %v753_v63 = vsub.f32 %v744_v57, %v752_v62 }
 0x2dd   : > { %v754_v2 = vmul.f32 1.442695, %v753_v63 }
 0x2df   : > { %3166 = vpow2.f32 %v754_v2 }
 0x2e9   : > { %v3167_v3 = vpop.eup %3166 }
 0x2ea   : > { %v756_v4 = vsel %vm703_vm1, %v3167_v3, 0.0 }
 0x2eb   : > { %757 = vadd.xlane.f32.xlu0 %v756_v4 }
 0x301   : > { %925 = vrot.lane.b32.xlu0 %v701_v52, %s3365_s30 }
 0x305   : > { %1265 = vrot.lane.b32.xlu0 %v700_v55, %s3368_s19 }
 0x309   : > { %1379 = vrot.lane.b32.xlu0 %v700_v55, %s3369_s12 }
 0x30d   : > { %1493 = vrot.lane.b32.xlu0 %v700_v55, %s3370_s11 }
 0x378   : > { %v758_v8 = vpop.xlane.xlu0 %757 }
 0x379   : > { %3168 = vrcp.f32 %v758_v8 }
 0x37c   : > { %v926_v10 = vpop.permute.xlu0 %925 }
 0x37d   : > { %v931_v11 = vsel %vm703_vm1, %v926_v10, 0 }
 0x37e   : > { %2889 = vmatpush3.bf16.xpose.msra.mxu0 %v931_v11 }
 0x37f   : > { %2900 = vmatprep.subr.bf16.mxu0 %v3361_v0 }
 0x380   : > { %v1266_v24 = vpop.permute.xlu0 %1265 }
 0x383   : > { %v3169_v13 = vpop.eup %3168 }
 0x384   : > { %v760_v14 = vmul.f32 %v3169_v13, %v3167_v3  ;;  %v1380_v27 = vpop.permute.xlu0 %1379 }
 0x385   : > { %2891 = vmatmul.mubr.msk.bf16.vlgmr.msra.gmra.mrb[4].mxu0 %vm703_vm1, %v924_v7 }
 0x386   : > { %2901 = vmatpush3.bf16.xpose.msra.mxu0 %v1045_v15  ;;  %v761_v17 = vpack.c.bf16 %v760_v14, %v760_v14  ;;  %2902 = vmatprep.mubr.msk.bf16.mxu0 %vm3363_vm0, %v3361_v0 }
 0x387   : > { %2912 = vmatprep.subr.bf16.mxu0 %v3361_v0 }
 0x388   : > { %2873 = vmatmul.mubr.msk.bf16.vlgmr.msra.gmra.mrb[8].mxu1 %vm703_vm1, %v761_v17  ;;  %v1494_v30 = vpop.permute.xlu0 %1493 }
 0x389   : > { %2877 = vmatpush3.bf16.xpose.msra.mxu1 %v816_v18  ;;  %2878 = vmatprep.mubr.msk.bf16.mxu1 %vm3363_vm0, %v3361_v0 }
 0x38a   : > { %2882 = vmatprep.subr.bf16.mxu1 %v3361_v0 }
 0x38d   : > { %2903 = vmatmul.mubr.msk.bf16.vlgmr.msra.gmra.mrb[8].mxu0 %vm703_vm1, %v1038_v12 }
 0x38e   : > { %2913 = vmatpush3.bf16.xpose.msra.mxu0 %v1159_v20  ;;  %2914 = vmatprep.mubr.msk.bf16.mxu0 %vm3363_vm0, %v3361_v0 }
 0x38f   : > { %2924 = vmatprep.subr.bf16.mxu0 %v3361_v0 }
 0x390   : > { %2879 = vmatmul.mubr.msk.bf16.vlgmr.msra.gmra.mrb[12].mxu1 %vm703_vm1, %v808_v6 }
 0x391   : > { %2884 = vmatprep.mubr.msk.bf16.mxu1 %vm3363_vm0, %v3361_v0 }
 0x395   : > { %2915 = vmatmul.mubr.msk.bf16.vlgmr.msra.gmra.mrb[12].mxu0 %vm703_vm1, %v1152_v19 }
 0x396   : > { %2925 = vmatpush3.bf16.xpose.msra.mxu0 %v1273_v22  ;;  %2926 = vmatprep.mubr.msk.bf16.mxu0 %vm3363_vm0, %v3361_v0 }
 0x397   : > { %2936 = vmatprep.subr.bf16.mxu0 %v3361_v0 }
 0x39d   : > { %2927 = vmatmul.mubr.msk.bf16.vlgmr.msra.gmra.mrb[16].mxu0 %vm703_vm1, %v1266_v24 }
 0x39e   : > { %2937 = vmatpush3.bf16.xpose.msra.mxu0 %v1387_v25  ;;  %2938 = vmatprep.mubr.msk.bf16.mxu0 %vm3363_vm0, %v3361_v0 }
 0x39f   : > { %2948 = vmatprep.subr.bf16.mxu0 %v3361_v0 }
 0x3a5   : > { %2939 = vmatmul.mubr.msk.bf16.vlgmr.msra.gmra.mrb[20].mxu0 %vm703_vm1, %v1380_v27 }
 0x3a6   : > { %2949 = vmatpush3.bf16.xpose.msra.mxu0 %v1501_v29  ;;  %2950 = vmatprep.mubr.msk.bf16.mxu0 %vm3363_vm0, %v3361_v0 }
 0x3a7   : > { %2960 = vmatprep.subr.bf16.mxu0 %v3361_v0 }
 0x3ad   : > { %2951 = vmatmul.mubr.msk.bf16.vlgmr.msra.gmra.mrb[24].mxu0 %vm703_vm1, %v1494_v30 }
 0x3ae   : > { %2976 = vmatprep.mubr.msk.bf16.mxu0 %vm3363_vm0, %v3361_v0 }
 0x458   : > { %v967_v31 = vpop.f32.mrb[4].mxu0 }
 0x459   : > { %v2892_v34 = vpop.f32.mrb[5].mxu0  ;;  %v973_v37 = vsel %vm703_vm1, %v967_v31, -inf }
 0x45a   : > { %974 = vmax.xlane.f32.xlu0 %v973_v37  ;;  %v970_v38 = vpop.f32.mrb[6].mxu0 }
 0x45b   : > { %v799_v39 = vpop.f32.mrb[8].mxu1  ;;  %v2893_v40 = vpop.f32.mrb[7].mxu0 }
 0x45c   : > { %805 = vst.msk [vmem:[#allocation2] sm:$0xff] %vm703_vm1, %v799_v39  ;;  %v2874_v41 = vpop.f32.mrb[9].mxu1 }
 0x45d   : > { %v802_v42 = vpop.f32.mrb[10].mxu1 }
 0x45e   : > { %v2875_v43 = vpop.f32.mrb[11].mxu1 }
 0x460   : > { %v1081_v44 = vpop.f32.mrb[8].mxu0 }
 0x461   : > { %v2904_v45 = vpop.f32.mrb[9].mxu0  ;;  %v1087_v46 = vsel %vm703_vm1, %v1081_v44, -inf }
 0x462   : > { %1088 = vmax.xlane.f32.xlu0 %v1087_v46  ;;  %v1084_v47 = vpop.f32.mrb[10].mxu0 }
 0x463   : > { %v852_v48 = vpop.f32.mrb[12].mxu1  ;;  %v2905_v49 = vpop.f32.mrb[11].mxu0 }
 0x464   : > { %v2880_v50 = vpop.f32.mrb[13].mxu1  ;;  %v858_v51 = vsel %vm703_vm1, %v852_v48, -inf }
 0x465   : > { %859 = vmax.xlane.f32.xlu1 %v858_v51  ;;  %v855_v52 = vpop.f32.mrb[14].mxu1 }
 0x466   : > { %v2881_v53 = vpop.f32.mrb[15].mxu1 }
 0x468   : > { %v1195_v55 = vpop.f32.mrb[12].mxu0 }
 0x469   : > { %v2916_v56 = vpop.f32.mrb[13].mxu0  ;;  %v1201_v57 = vsel %vm703_vm1, %v1195_v55, -inf }
 0x46a   : > { %1202 = vmax.xlane.f32.xlu1 %v1201_v57  ;;  %v1198_v58 = vpop.f32.mrb[14].mxu0 }
 0x46b   : > { %v2917_v59 = vpop.f32.mrb[15].mxu0 }
 0x470   : > { %v1309_v60 = vpop.f32.mrb[16].mxu0 }
 0x471   : > { %v2928_v61 = vpop.f32.mrb[17].mxu0  ;;  %v1315_v62 = vsel %vm703_vm1, %v1309_v60, -inf }
 0x472   : > { %1316 = vmax.xlane.f32.xlu0 %v1315_v62  ;;  %v1312_v63 = vpop.f32.mrb[18].mxu0 }
 0x473   : > { %v2929_v2 = vpop.f32.mrb[19].mxu0 }
 0x478   : > { %v1423_v3 = vpop.f32.mrb[20].mxu0 }
 0x479   : > { %v2940_v4 = vpop.f32.mrb[21].mxu0  ;;  %v1429_v5 = vsel %vm703_vm1, %v1423_v3, -inf }
 0x47a   : > { %1430 = vmax.xlane.f32.xlu1 %v1429_v5  ;;  %v1426_v6 = vpop.f32.mrb[22].mxu0 }
 0x47b   : > { %v2941_v7 = vpop.f32.mrb[23].mxu0 }
 0x480   : > { %v1537_v8 = vpop.f32.mrb[24].mxu0 }
 0x481   : > { %v2952_v9 = vpop.f32.mrb[25].mxu0  ;;  %v1543_v10 = vsel %vm703_vm1, %v1537_v8, -inf }
 0x482   : > { %1544 = vmax.xlane.f32.xlu0 %v1543_v10  ;;  %v1540_v11 = vpop.f32.mrb[26].mxu0 }
 0x483   : > { %v2953_v12 = vpop.f32.mrb[27].mxu0 }
 0x4e7   : > { %v975_v13 = vpop.xlane.xlu0 %974 }
 0x4e8   : > { %v976_v14 = vsub.f32 %v967_v31, %v975_v13 }
 0x4ea   : > { %v977_v15 = vmul.f32 1.442695, %v976_v14 }
 0x4ec   : > { %3170 = vpow2.f32 %v977_v15 }
 0x4ef   : > { %v1089_v16 = vpop.xlane.xlu0 %1088 }
 0x4f0   : > { %v1090_v17 = vsub.f32 %v1081_v44, %v1089_v16 }
 0x4f2   : > { %v1091_v18 = vmul.f32 1.442695, %v1090_v17  ;;  %v860_v19 = vpop.xlane.xlu1 %859 }
 0x4f3   : > { %v861_v20 = vsub.f32 %v852_v48, %v860_v19 }
 0x4f4   : > { %3172 = vpow2.f32 %v1091_v18 }
 0x4f5   : > { %v862_v21 = vmul.f32 1.442695, %v861_v20 }
 0x4f6   : > { %v3715_v22 = vpop.eup %3170 }
 0x4f7   : > { %3174 = vpow2.f32 %v862_v21  ;;  %v1203_v23 = vpop.xlane.xlu1 %1202  ;;  %v979_v24 = vsel %vm703_vm1, %v3715_v22, 0.0 }
 0x4f8   : > { %v1204_v25 = vsub.f32 %v1195_v55, %v1203_v23  ;;  %980 = vadd.xlane.f32.xlu0 %v979_v24 }
 0x4fa   : > { %v1205_v26 = vmul.f32 1.442695, %v1204_v25 }
 0x4fc   : > { %3176 = vpow2.f32 %v1205_v26 }
 0x4fe   : > { %v3719_v27 = vpop.eup %3172 }
 0x4ff   : > { %v1317_v29 = vpop.xlane.xlu0 %1316  ;;  %v1093_v30 = vsel %vm703_vm1, %v3719_v27, 0.0 }
 0x500   : > { %v1318_v31 = vsub.f32 %v1309_v60, %v1317_v29  ;;  %1094 = vadd.xlane.f32.xlu1 %v1093_v30 }
 0x501   : > { %v3175_v34 = vpop.eup %3174 }
 0x502   : > { %v1319_v37 = vmul.f32 1.442695, %v1318_v31  ;;  %v864_v38 = vsel %vm703_vm1, %v3175_v34, 0.0 }
 0x504   : > { %3178 = vpow2.f32 %v1319_v37  ;;  %865 = vadd.xlane.f32.xlu1 %v864_v38 }
 0x506   : > { %v3177_v39 = vpop.eup %3176 }
 0x507   : > { %v1207_v40 = vsel %vm703_vm1, %v3177_v39, 0.0  ;;  %v1431_v43 = vpop.xlane.xlu1 %1430 }
 0x508   : > { %1208 = vadd.xlane.f32.xlu0 %v1207_v40  ;;  %v1432_v44 = vsub.f32 %v1423_v3, %v1431_v43  ;;  %v3078_v43 = vld [vmem:[#allocation5] sm:$0xff]  }
 0x509   : > { %2961 = vmatpush3.bf16.msra.mxu0 %v3078_v43  ;;  %v3112_v43 = vld [vmem:[#allocation7 + $0x84] ss:$16 sps:$4 sm:$0xff]  }
 0x50a   : > { %v1433_v45 = vmul.f32 1.442695, %v1432_v44  ;;  %v3079_v44 = vld [vmem:[#allocation5 + $0x8] sm:$0xff]   ;;  %2962 = vmatprep.subr.bf16.mxu0 %v3361_v0 }
 0x50c   : > { %3180 = vpow2.f32 %v1433_v45 }
 0x50d   : > { %2963 = vmatpush3.bf16.msra.mxu0 %v3079_v44  ;;  %v3115_v44 = vld [vmem:[#allocation7 + $0x8c] ss:$16 sps:$4 sm:$0xff]  }
 0x50e   : > { %v3725_v41 = vpop.eup %3178  ;;  %2964 = vmatprep.subr.bf16.mxu0 %v3361_v0 }
 0x50f   : > { %v1321_v42 = vsel %vm703_vm1, %v3725_v41, 0.0  ;;  %v1545_v46 = vpop.xlane.xlu0 %1544 }
 0x510   : > { %1322 = vadd.xlane.f32.xlu0 %v1321_v42  ;;  %v1546_v47 = vsub.f32 %v1537_v8, %v1545_v46 }
 0x512   : > { %v1547_v49 = vmul.f32 1.442695, %v1546_v47 }
 0x514   : > { %3182 = vpow2.f32 %v1547_v49  ;;  %v3080_v49 = vld [vmem:[#allocation5 + $0x10] sm:$0xff]  }
 0x515   : > { %871 = vrot.lane.b32.xlu1 %v3644_v54, %s3364_s29  ;;  %2965 = vmatpush3.bf16.msra.mxu0 %v3080_v49  ;;  %v3116_v49 = vld [vmem:[#allocation7 + $0xa0] ss:$16 sps:$4 sm:$0xff]  }
 0x516   : > { %v3735_v48 = vpop.eup %3180  ;;  %2966 = vmatprep.subr.bf16.mxu0 %v3361_v0 }
 0x517   : > { %v1435_v50 = vsel %vm703_vm1, %v3735_v48, 0.0 }
 0x51e   : > { %v3739_v51 = vpop.eup %3182 }
 0x51f   : > { %v1549_v52 = vsel %vm703_vm1, %v3739_v51, 0.0 }
 0x526   : > { %985 = vrot.lane.b32.xlu0 %v3644_v54, %s3365_s30 }
 0x52a   : > { %1099 = vrot.lane.b32.xlu0 %v3644_v54, %s3366_s15 }
 0x539   : > { %1436 = vadd.xlane.f32.xlu1 %v1435_v50  ;;  %v3081_v50 = vld [vmem:[#allocation5 + $0x18] sm:$0xff]  }
 0x53a   : > { %2967 = vmatpush3.bf16.msra.mxu0 %v3081_v50  ;;  %v3119_v50 = vld [vmem:[#allocation7 + $0xa8] ss:$16 sps:$4 sm:$0xff]  }
 0x53b   : > { %2968 = vmatprep.subr.bf16.mxu0 %v3361_v0 }
 0x549   : > { %1550 = vadd.xlane.f32.xlu0 %v1549_v52  ;;  %v3083_v52 = vld [vmem:[#allocation5 + $0x28] sm:$0xff]  }
 0x54a   : > { %1213 = vrot.lane.b32.xlu1 %v3644_v54, %s3367_s22 }
 0x54e   : > { %1441 = vrot.lane.b32.xlu1 %v3644_v54, %s3369_s12 }
 0x552   : > { %1555 = vrot.lane.b32.xlu1 %v3644_v54, %s3370_s11 }
 0x55f   : > { %1327 = vrot.lane.b32.xlu0 %v3644_v54, %s3368_s19 }
 0x585   : > { %v981_v56 = vpop.xlane.xlu0 %980 }
 0x58d   : > { %v1095_v53 = vpop.xlane.xlu1 %1094 }
 0x591   : > { %v866_v55 = vpop.xlane.xlu1 %865 }
 0x592   : > { %3184 = vrcp.f32 %v866_v55 }
 0x593   : > { %3186 = vrcp.f32 %v981_v56 }
 0x594   : > { %3188 = vrcp.f32 %v1095_v53 }
 0x595   : > { %v872_v57 = vpop.permute.xlu1 %871  ;;  %v1209_v58 = vpop.xlane.xlu0 %1208 }
 0x596   : > { %2883 = vmatpush3.bf16.msra.mxu1 %v872_v57  ;;  %3190 = vrcp.f32 %v1209_v58  ;;  %v3084_v58 = vld [vmem:[#allocation5 + $0x30] sm:$0xff]  }
 0x597   : > { %2894 = vmatprep.subr.bf16.mxu1 %v3361_v0 }
 0x59c   : > { %v3185_v59 = vpop.eup %3184 }
 0x59d   : > { %v868_v60 = vmul.f32 %v3185_v59, %v3175_v34  ;;  %v1323_v61 = vpop.xlane.xlu0 %1322  ;;  %v3187_v63 = vpop.eup %3186  ;;  %v3085_v59 = vld [vmem:[#allocation5 + $0x38] sm:$0xff]  }
 0x59e   : > { %v983_v54 = vmul.f32 %v3187_v63, %v3715_v22  ;;  %v3189_v4 = vpop.eup %3188  ;;  %3192 = vrcp.f32 %v1323_v61 }
 0x59f   : > { %v869_v62 = vpack.c.bf16 %v868_v60, %v868_v60  ;;  %v1097_v6 = vmul.f32 %v3189_v4, %v3719_v27 }
 0x5a0   : > { %v984_v3 = vpack.c.bf16 %v983_v54, %v983_v54  ;;  %v3191_v8 = vpop.eup %3190 }
 0x5a1   : > { %2885 = vmatmul.mubr.msk.bf16.vlgmr.msra.gmra.mrb[16].mxu1 %vm703_vm1, %v869_v62  ;;  %v986_v2 = vpop.permute.xlu0 %985  ;;  %v1098_v7 = vpack.c.bf16 %v1097_v6, %v1097_v6  ;;  %v1211_v10 = vmul.f32 %v3191_v8, %v3177_v39 }
 0x5a2   : > { %2895 = vmatpush3.bf16.msra.mxu1 %v986_v2  ;;  %2896 = vmatprep.mubr.msk.bf16.mxu1 %vm3363_vm0, %v3361_v0 }
 0x5a3   : > { %2906 = vmatprep.subr.bf16.mxu1 %v3361_v0  ;;  %v1212_v12 = vpack.c.bf16 %v1211_v10, %v1211_v10 }
 0x5a5   : > { %v1100_v5 = vpop.permute.xlu0 %1099 }
 0x5a8   : > { %v3193_v13 = vpop.eup %3192 }
 0x5a9   : > { %2897 = vmatmul.mubr.msk.bf16.vlgmr.msra.gmra.mrb[20].mxu1 %vm703_vm1, %v984_v3  ;;  %v1325_v15 = vmul.f32 %v3193_v13, %v3725_v41  ;;  %v1628_v13 = vrot.slane %v3638_v36, %v3633_v35 }
 0x5aa   : > { %2907 = vmatpush3.bf16.msra.mxu1 %v1100_v5  ;;  %2908 = vmatprep.mubr.msk.bf16.mxu1 %vm3363_vm0, %v3361_v0 }
 0x5ab   : > { %2918 = vmatprep.subr.bf16.mxu1 %v3361_v0  ;;  %v1326_v17 = vpack.c.bf16 %v1325_v15, %v1325_v15 }
 0x5b1   : > { %2909 = vmatmul.mubr.msk.bf16.vlgmr.msra.gmra.mrb[24].mxu1 %vm703_vm1, %v1098_v7 }
 0x5b2   : > { %2920 = vmatprep.mubr.msk.bf16.mxu1 %vm3363_vm0, %v3361_v0 }
 0x5c6   : > { %v1437_v9 = vpop.xlane.xlu1 %1436 }
 0x5c7   : > { %3194 = vrcp.f32 %v1437_v9 }
 0x5ca   : > { %v1214_v11 = vpop.permute.xlu1 %1213 }
 0x5cb   : > { %2919 = vmatpush3.bf16.msra.mxu1 %v1214_v11 }
 0x5cc   : > { %2930 = vmatprep.subr.bf16.mxu1 %v3361_v0 }
 0x5ce   : > { %2921 = vmatmul.mubr.msk.bf16.vlgmr.msra.gmra.mrb[28].mxu1 %vm703_vm1, %v1212_v12  ;;  %v1442_v19 = vpop.permute.xlu1 %1441 }
 0x5cf   : > { %2932 = vmatprep.mubr.msk.bf16.mxu1 %vm3363_vm0, %v3361_v0 }
 0x5d1   : > { %v3195_v18 = vpop.eup %3194 }
 0x5d2   : > { %v1439_v20 = vmul.f32 %v3195_v18, %v3735_v48  ;;  %v1556_v23 = vpop.permute.xlu1 %1555 }
 0x5d4   : > { %v1440_v21 = vpack.c.bf16 %v1439_v20, %v1439_v20  ;;  %v3086_v20 = vld [vmem:[#allocation7] ss:$16 sps:$4 sm:$0xff]  }
 0x5d6   : > { %v1551_v14 = vpop.xlane.xlu0 %1550 }
 0x5d7   : > { %3196 = vrcp.f32 %v1551_v14 }
 0x5da   : > { %v1328_v16 = vpop.permute.xlu0 %1327 }
 0x5db   : > { %2931 = vmatpush3.bf16.msra.mxu1 %v1328_v16 }
 0x5dc   : > { %2942 = vmatprep.subr.bf16.mxu1 %v3361_v0 }
 0x5de   : > { %2933 = vmatmul.mubr.msk.bf16.vlgmr.msra.gmra.mrb[32].mxu1 %vm703_vm1, %v1326_v17 }
 0x5df   : > { %2943 = vmatpush3.bf16.msra.mxu1 %v1442_v19  ;;  %2944 = vmatprep.mubr.msk.bf16.mxu1 %vm3363_vm0, %v3361_v0 }
 0x5e0   : > { %2954 = vmatprep.subr.bf16.mxu1 %v3361_v0 }
 0x5e1   : > { %v3197_v22 = vpop.eup %3196 }
 0x5e2   : > { %v1553_v24 = vmul.f32 %v3197_v22, %v3739_v51  ;;  %v3082_v51 = vld [vmem:[#allocation5 + $0x20] sm:$0xff]   ;;  %v3089_v22 = vld [vmem:[#allocation7 + $0x8] ss:$16 sps:$4 sm:$0xff]  }
 0x5e3   : > { %2969 = vmatpush3.bf16.msra.mxu0 %v3082_v51  ;;  %v3124_v51 = vld [vmem:[#allocation7 + $0xc4] ss:$16 sps:$4 sm:$0xff]  }
 0x5e4   : > { %v1554_v25 = vpack.c.bf16 %v1553_v24, %v1553_v24  ;;  %2970 = vmatprep.subr.bf16.mxu0 %v3361_v0  ;;  %v3094_v24 = vld [vmem:[#allocation7 + $0x24] ss:$16 sps:$4 sm:$0xff]  }
 0x5e6   : > { %2945 = vmatmul.mubr.msk.bf16.vlgmr.msra.gmra.mrb[36].mxu1 %vm703_vm1, %v1440_v21  ;;  %v3088_v21 = vld [vmem:[#allocation7 + $0x4] ss:$16 sps:$4 sm:$0xff]  }
 0x5e7   : > { %2955 = vmatpush3.bf16.msra.mxu1 %v1556_v23  ;;  %2956 = vmatprep.mubr.msk.bf16.mxu1 %vm3363_vm0, %v3361_v0  ;;  %v3091_v23 = vld [vmem:[#allocation7 + $0xc] ss:$16 sps:$4 sm:$0xff]  }
 0x5e8   : > { %2971 = vmatpush3.bf16.msra.mxu0 %v3083_v52  ;;  %1955 = vmatprep.subr.bf16.mxu1 %v3088_v21  ;;  %v3127_v52 = vld [vmem:[#allocation7 + $0xcc] ss:$16 sps:$4 sm:$0xff]  }
 0x5e9   : > { %2972 = vmatprep.subr.bf16.mxu0 %v3361_v0  ;;  %v3148_v21 = vld [vmem:[#allocation8 + $0x18] sm:$0xff]  }
 0x5ec   : > { %2973 = vmatpush3.bf16.msra.mxu0 %v3084_v58  ;;  %v3128_v58 = vld [vmem:[#allocation7 + $0xe0] ss:$16 sps:$4 sm:$0xff]  }
 0x5ed   : > { %2974 = vmatprep.subr.bf16.mxu0 %v3361_v0 }
 0x5ee   : > { %2957 = vmatmul.mubr.msk.bf16.vlgmr.msra.gmra.mrb[40].mxu1 %vm703_vm1, %v1554_v25  ;;  %v3097_v25 = vld [vmem:[#allocation7 + $0x2c] ss:$16 sps:$4 sm:$0xff]  }
 0x5ef   : > { %1987 = vmatprep.mubr.bf16.mxu1 %v3362_v1  ;;  %1956 = vmatpush1.bf16.msra.mxu1 %v3086_v20  ;;  %v3147_v20 = vld [vmem:[#allocation8 + $0xd8] sm:$0xff]  }
 0x5f0   : > { %2975 = vmatpush3.bf16.msra.mxu0 %v3085_v59  ;;  %1957 = vmatprep.subr.bf16.mxu1 %v3094_v24  ;;  %v3131_v59 = vld [vmem:[#allocation7 + $0xe8] ss:$16 sps:$4 sm:$0xff]   ;;  %v3151_v24 = vld [vmem:[#allocation8 + $0xe0] sm:$0xff]  }
 0x5f1   : > { %1996 = vmatprep.subr.bf16.mxu0 %v3091_v23  ;;  %v3150_v23 = vld [vmem:[#allocation8 + $0x60] sm:$0xff]  }
 0x674   : > { %v911_v26 = vpop.f32.mrb[16].mxu1 }
 0x675   : > { %918 = vrot.lane.b32.xlu1 %v911_v26, %s3370_s11  ;;  %v2886_v27 = vpop.f32.mrb[17].mxu1  ;;  %v3095_v26 = vld [vmem:[#allocation7 + $0x28] ss:$16 sps:$4 sm:$0xff]  }
 0x676   : > { %v914_v29 = vpop.f32.mrb[18].mxu1  ;;  %v3100_v27 = vld [vmem:[#allocation7 + $0x44] ss:$16 sps:$4 sm:$0xff]  }
 0x677   : > { %v2887_v30 = vpop.f32.mrb[19].mxu1  ;;  %v3103_v29 = vld [vmem:[#allocation7 + $0x4c] ss:$16 sps:$4 sm:$0xff]  }
 0x678   : > { %v3098_v30 = vld [vmem:[#allocation7 + $0x40] ss:$16 sps:$4 sm:$0xff]  }
 0x67c   : > { %v1025_v31 = vpop.f32.mrb[20].mxu1 }
 0x67d   : > { %1032 = vrot.lane.b32.xlu1 %v1025_v31, %s3369_s12  ;;  %v2898_v34 = vpop.f32.mrb[21].mxu1 }
 0x67e   : > { %v1028_v37 = vpop.f32.mrb[22].mxu1 }
 0x67f   : > { %v2899_v38 = vpop.f32.mrb[23].mxu1 }
 0x684   : > { %v1139_v39 = vpop.f32.mrb[24].mxu1 }
 0x685   : > { %1146 = vrot.lane.b32.xlu0 %v1139_v39, %s3368_s19  ;;  %v2910_v40 = vpop.f32.mrb[25].mxu1  ;;  %v3106_v39 = vld [vmem:[#allocation7 + $0x64] ss:$16 sps:$4 sm:$0xff]  }
 0x686   : > { %v1142_v41 = vpop.f32.mrb[26].mxu1  ;;  %v3109_v40 = vld [vmem:[#allocation7 + $0x6c] ss:$16 sps:$4 sm:$0xff]  }
 0x687   : > { %v2911_v42 = vpop.f32.mrb[27].mxu1  ;;  %v3104_v41 = vld [vmem:[#allocation7 + $0x60] ss:$16 sps:$4 sm:$0xff]  }
 0x688   : > { %v3107_v42 = vld [vmem:[#allocation7 + $0x68] ss:$16 sps:$4 sm:$0xff]  }
 0x6a1   : > { %v1253_v45 = vpop.f32.mrb[28].mxu1 }
 0x6a2   : > { %1260 = vrot.lane.b32.xlu1 %v1253_v45, %s3367_s22  ;;  %v2922_v46 = vpop.f32.mrb[29].mxu1  ;;  %v3110_v45 = vld [vmem:[#allocation7 + $0x80] ss:$16 sps:$4 sm:$0xff]  }
 0x6a3   : > { %v1256_v47 = vpop.f32.mrb[30].mxu1  ;;  %v3113_v46 = vld [vmem:[#allocation7 + $0x88] ss:$16 sps:$4 sm:$0xff]  }
 0x6a4   : > { %v2923_v48 = vpop.f32.mrb[31].mxu1  ;;  %v3118_v47 = vld [vmem:[#allocation7 + $0xa4] ss:$16 sps:$4 sm:$0xff]  }
 0x6a5   : > { %v3121_v48 = vld [vmem:[#allocation7 + $0xac] ss:$16 sps:$4 sm:$0xff]  }
 0x6b1   : > { %v1367_v53 = vpop.f32.mrb[32].mxu1 }
 0x6b2   : > { %1374 = vrot.lane.b32.xlu0 %v1367_v53, %s3366_s15  ;;  %v2934_v55 = vpop.f32.mrb[33].mxu1  ;;  %v3122_v53 = vld [vmem:[#allocation7 + $0xc0] ss:$16 sps:$4 sm:$0xff]  }
 0x6b3   : > { %v1370_v56 = vpop.f32.mrb[34].mxu1  ;;  %v3125_v55 = vld [vmem:[#allocation7 + $0xc8] ss:$16 sps:$4 sm:$0xff]  }
 0x6b4   : > { %v2935_v57 = vpop.f32.mrb[35].mxu1  ;;  %v3130_v56 = vld [vmem:[#allocation7 + $0xe4] ss:$16 sps:$4 sm:$0xff]  }
 0x6b5   : > { %v3133_v57 = vld [vmem:[#allocation7 + $0xec] ss:$16 sps:$4 sm:$0xff]  }
 0x6b9   : > { %v1481_v60 = vpop.f32.mrb[36].mxu1 }
 0x6ba   : > { %1488 = vrot.lane.b32.xlu1 %v1481_v60, %s3365_s30  ;;  %v2946_v61 = vpop.f32.mrb[37].mxu1 }
 0x6bb   : > { %v1484_v62 = vpop.f32.mrb[38].mxu1 }
 0x6bc   : > { %v2947_v63 = vpop.f32.mrb[39].mxu1 }
 0x6bd   : > { %v1732_v63 = vsub.s32 3, %v3624_v32 }
 0x6c1   : > { %v1595_v2 = vpop.f32.mrb[40].mxu1 }
 0x6c2   : > { %1602 = vrot.lane.b32.xlu0 %v1595_v2, %s3364_s29  ;;  %v2958_v54 = vpop.f32.mrb[41].mxu1  ;;  %v1737_v2 = vsub.s32 4, %v3624_v32 }
 0x6c3   : > { %v1598_v3 = vpop.f32.mrb[42].mxu1  ;;  %v1733_v54 = vrot.slane %v3638_v36, %v1732_v63 }
 0x6c4   : > { %v2959_v4 = vpop.f32.mrb[43].mxu1 }
 0x6e7   : > { %v919_v5 = vpop.permute.xlu1 %918 }
 0x6e8   : > { %922 = vst.msk [vmem:[#allocation2] sm:$0xff] %vm921_vm2, %v919_v5  ;;  %v1738_v5 = vrot.slane %v3638_v36, %v1737_v2  ;;  %v3141_v36 = vld [vmem:[#allocation8 + $0x88] sm:$0xff]  }
 0x6ef   : > { %v1033_v6 = vpop.permute.xlu1 %1032 }
 0x6f0   : > { %1036 = vst.msk [vmem:[#allocation2] sm:$0xff] %vm1035_vm3, %v1033_v6 }
 0x6f7   : > { %v1147_v0 = vpop.permute.xlu0 %1146 }
 0x6f8   : > { %1150 = vst.msk [vmem:[#allocation2] sm:$0xff] %vm1149_vm4, %v1147_v0 }
 0x714   : > { %v1261_v7 = vpop.permute.xlu1 %1260 }
 0x715   : > { %1264 = vst.msk [vmem:[#allocation2] sm:$0xff] %vm1263_vm5, %v1261_v7 }
 0x724   : > { %v1375_v8 = vpop.permute.xlu0 %1374 }
 0x725   : > { %1378 = vst.msk [vmem:[#allocation2] sm:$0xff] %vm1377_vm6, %v1375_v8  ;;  %v3134_v8 = vld [vmem:[#allocation8 + $0x40] sm:$0xff]  }
 0x72c   : > { %v1489_v9 = vpop.permute.xlu1 %1488 }
 0x72d   : > { %1492 = vst.msk [vmem:[#allocation2] sm:$0xff] %vm1491_vm7, %v1489_v9  ;;  %v3135_v9 = vld [vmem:[#allocation8 + $0xc0] sm:$0xff]  }
 0x734   : > { %v1603_v10 = vpop.permute.xlu0 %1602 }
 0x735   : > { %1606 = vst.msk [vmem:[#allocation2] sm:$0xff] %vm1605_vm8, %v1603_v10  ;;  %v3136_v10 = vld [vmem:[#allocation8] sm:$0xff]  }
 0x73c   : > { %v1607_v11 = vld [vmem:[#allocation2] sm:$0xff] }
 0x73d   : > { %v1608_v12 = vpack.c.bf16 %v1607_v11, %v1607_v11  ;;  %v3137_v11 = vld [vmem:[#allocation8 + $0x80] sm:$0xff]  }
 0x73f   : > { %2977 = vmatmul.mubr.bf16.vlgmr.msra.gmra.mrb[28].mxu0 %v1608_v12  ;;  %v3138_v12 = vld [vmem:[#allocation8 + $0x48] sm:$0xff]  }
 0x740   : > { %2028 = vmatprep.mubr.bf16.mxu0 %v3362_v1  ;;  %v3092_v1 = vld [vmem:[#allocation7 + $0x20] ss:$16 sps:$4 sm:$0xff]   ;;  %1997 = vmatpush1.bf16.msra.mxu0 %v3089_v22  ;;  %v3149_v22 = vld [vmem:[#allocation8 + $0x98] sm:$0xff]  }
 0x741   : > { %1998 = vmatprep.subr.bf16.mxu0 %v3097_v25  ;;  %1958 = vmatpush1.bf16.msra.mxu1 %v3092_v1  ;;  %v3152_v25 = vld [vmem:[#allocation8 + $0x20] sm:$0xff]  }
 0x742   : > { %1959 = vmatprep.subr.bf16.mxu1 %v3100_v27  ;;  %v3153_v1 = vld [vmem:[#allocation8 + $0xa0] sm:$0xff]   ;;  %v3155_v27 = vld [vmem:[#allocation8 + $0xe8] sm:$0xff]  }
 0x744   : > { %1999 = vmatpush1.bf16.msra.mxu0 %v3095_v26  ;;  %v3154_v26 = vld [vmem:[#allocation8 + $0x68] sm:$0xff]  }
 0x745   : > { %2000 = vmatprep.subr.bf16.mxu0 %v3103_v29  ;;  %1960 = vmatpush1.bf16.msra.mxu1 %v3098_v30  ;;  %v3156_v29 = vld [vmem:[#allocation8 + $0x28] sm:$0xff]  }
 0x746   : > { %1961 = vmatprep.subr.bf16.mxu1 %v3106_v39  ;;  %v3157_v30 = vld [vmem:[#allocation8 + $0xa8] sm:$0xff]   ;;  %v3163_v39 = vld [vmem:[#allocation8 + $0xf8] sm:$0xff]  }
 0x749   : > { %1962 = vmatpush1.bf16.msra.mxu1 %v3104_v41  ;;  %v3165_v41 = vld [vmem:[#allocation8 + $0xb8] sm:$0xff]  }
 0x74a   : > { %1963 = vmatprep.subr.bf16.mxu1 %v3112_v43  ;;  %v1773_v43 = vld [vmem:[%s3876_s8] sm:$0xf] }
 0x74d   : > { %1964 = vmatpush1.bf16.msra.mxu1 %v3110_v45 }
 0x74e   : > { %1965 = vmatprep.subr.bf16.mxu1 %v3118_v47  ;;  %v1790_v47 = vrot.slane %v1773_v43, %v1732_v63 }
 0x751   : > { %1966 = vmatpush1.bf16.msra.mxu1 %v3116_v49 }
 0x752   : > { %1967 = vmatprep.subr.bf16.mxu1 %v3124_v51 }
 0x755   : > { %1968 = vmatpush1.bf16.msra.mxu1 %v3122_v53 }
 0x756   : > { %1969 = vmatprep.subr.bf16.mxu1 %v3130_v56 }
 0x759   : > { %1970 = vmatpush1.bf16.msra.mxu1 %v3128_v58 }
 0x75a   : > { %2800 = vmatprep.subr.bf16.mxu1 %v3134_v8 }
 0x812   : > { %v1711_v14 = vpop.f32.mrb[28].mxu0 }
 0x813   : > { %v1712_v15 = vadd.f32 %v1711_v14, %v1628_v13  ;;  %v2978_v16 = vpop.f32.mrb[29].mxu0  ;;  %v3139_v13 = vld [vmem:[#allocation8 + $0xc8] sm:$0xff]  }
 0x814   : > { %v1714_v17 = vpop.f32.mrb[30].mxu0  ;;  %v3140_v14 = vld [vmem:[#allocation8 + $0x8] sm:$0xff]   ;;  %v3143_v16 = vld [vmem:[#allocation8 + $0xd0] sm:$0xff]  }
 0x815   : > { %v2979_v18 = vpop.f32.mrb[31].mxu0  ;;  %v1717_v19 = vadd.f32 %v1712_v15, %v3613_v28  ;;  %v3101_v28 = vld [vmem:[#allocation7 + $0x48] ss:$16 sps:$4 sm:$0xff]   ;;  %v3142_v15 = vld [vmem:[#allocation8 + $0x50] sm:$0xff]  }
 0x816   : > { %2001 = vmatpush1.bf16.msra.mxu0 %v3101_v28  ;;  %v3144_v17 = vld [vmem:[#allocation8 + $0x10] sm:$0xff]  }
 0x817   : > { %1718 = vadd.xlane.f32.xlu1 %v1717_v19  ;;  %2002 = vmatprep.subr.bf16.mxu0 %v3109_v40  ;;  %v3145_v18 = vld [vmem:[#allocation8 + $0x90] sm:$0xff]   ;;  %v3164_v40 = vld [vmem:[#allocation8 + $0x38] sm:$0xff]  }
 0x818   : > { %v3158_v28 = vld [vmem:[#allocation8 + $0x70] sm:$0xff]  }
 0x81a   : > { %2003 = vmatpush1.bf16.msra.mxu0 %v3107_v42  ;;  %v1785_v42 = vsub.s32 2, %v3624_v32 }
 0x81b   : > { %2004 = vmatprep.subr.bf16.mxu0 %v3115_v44  ;;  %v1778_v44 = vrot.slane %v1773_v43, %v3627_v33 }
 0x81c   : > { %v1786_v45 = vrot.slane %v1773_v43, %v1785_v42 }
 0x81e   : > { %2005 = vmatpush1.bf16.msra.mxu0 %v3113_v46  ;;  %v1782_v46 = vrot.slane %v1773_v43, %v3633_v35 }
 0x81f   : > { %2006 = vmatprep.subr.bf16.mxu0 %v3121_v48 }
 0x822   : > { %2007 = vmatpush1.bf16.msra.mxu0 %v3119_v50 }
 0x823   : > { %2008 = vmatprep.subr.bf16.mxu0 %v3127_v52 }
 0x826   : > { %2009 = vmatpush1.bf16.msra.mxu0 %v3125_v55 }
 0x827   : > { %2010 = vmatprep.subr.bf16.mxu0 %v3133_v57 }
 0x82a   : > { %2011 = vmatpush1.bf16.msra.mxu0 %v3131_v59 }
 0x82b   : > { %2822 = vmatprep.subr.bf16.mxu0 %v3135_v9 }
 0x8a4   : > { %v1719_v31 = vpop.xlane.xlu1 %1718 }
 0x8a5   : > { %v1721_v34 = vmul.f32 0.0078125, %v1719_v31  ;;  %v3159_v31 = vld [vmem:[#allocation8 + $0xf0] sm:$0xff]  }
 0x8a7   : > { %v1722_v37 = vsub.f32 %v1717_v19, %v1721_v34  ;;  %v3146_v19 = vld [vmem:[#allocation8 + $0x58] sm:$0xff]   ;;  %v3160_v34 = vld [vmem:[#allocation8 + $0x30] sm:$0xff]  }
 0x8a9   : > { %v1723_v38 = vmul.f32 %v1722_v37, %v1722_v37 }
 0x8ab   : > { %1724 = vadd.xlane.f32.xlu0 %v1723_v38  ;;  %v3162_v38 = vld [vmem:[#allocation8 + $0x78] sm:$0xff]  }
 0x938   : > { %v1725_v60 = vpop.xlane.xlu0 %1724 }
 0x939   : > { %v1726_v61 = vmul.f32 0.0078125, %v1725_v60 }
 0x93b   : > { %v1727_v62 = vadd.f32 1e-12, %v1726_v61 }
 0x93d   : > { %3198 = vrsqrt.f32 %v1727_v62 }
 0x947   : > { %v3199_v3 = vpop.eup %3198 }
 0x948   : > { %v1729_v4 = vmul.f32 %v3199_v3, %v1722_v37  ;;  %v3161_v37 = vld [vmem:[#allocation8 + $0xb0] sm:$0xff]  }
 0x94a   : > { %v1734_v6 = vmul.f32 %v1733_v54, %v1729_v4 }
 0x94c   : > { %v3806_v0 = vadd.f32 %v1738_v5, %v1734_v6 }
 0x94e   : > { %v1740_v7 = vpack.c.bf16 %v3806_v0, %v3806_v0 }
 0x950   : > { %1988 = vmatmul.mubr.bf16.vlgmr.msra.gmra.mrb[44].mxu1 %v1740_v7  ;;  %2029 = vmatmul.mubr.bf16.vlgmr.msra.gmra.mrb[32].mxu0 %v1740_v7 }
 0x951   : > { %2801 = vmatpush3.bf16.msra.mxu1 %v3136_v10  ;;  %2823 = vmatpush3.bf16.msra.mxu0 %v3137_v11 }
 0x952   : > { %2802 = vmatprep.subr.bf16.mxu1 %v3138_v12  ;;  %2824 = vmatprep.subr.bf16.mxu0 %v3139_v13 }
 0x955   : > { %2803 = vmatpush3.bf16.msra.mxu1 %v3140_v14  ;;  %2825 = vmatpush3.bf16.msra.mxu0 %v3141_v36 }
 0x956   : > { %2804 = vmatprep.subr.bf16.mxu1 %v3142_v15  ;;  %2826 = vmatprep.subr.bf16.mxu0 %v3143_v16 }
 0x959   : > { %2805 = vmatpush3.bf16.msra.mxu1 %v3144_v17  ;;  %2827 = vmatpush3.bf16.msra.mxu0 %v3145_v18 }
 0x95a   : > { %2806 = vmatprep.subr.bf16.mxu1 %v3146_v19  ;;  %2828 = vmatprep.subr.bf16.mxu0 %v3147_v20 }
 0x95d   : > { %2807 = vmatpush3.bf16.msra.mxu1 %v3148_v21  ;;  %2829 = vmatpush3.bf16.msra.mxu0 %v3149_v22 }
 0x95e   : > { %2808 = vmatprep.subr.bf16.mxu1 %v3150_v23  ;;  %2830 = vmatprep.subr.bf16.mxu0 %v3151_v24 }
 0x961   : > { %2809 = vmatpush3.bf16.msra.mxu1 %v3152_v25  ;;  %2831 = vmatpush3.bf16.msra.mxu0 %v3153_v1 }
 0x962   : > { %2810 = vmatprep.subr.bf16.mxu1 %v3154_v26  ;;  %2832 = vmatprep.subr.bf16.mxu0 %v3155_v27 }
 0x965   : > { %2811 = vmatpush3.bf16.msra.mxu1 %v3156_v29  ;;  %2833 = vmatpush3.bf16.msra.mxu0 %v3157_v30 }
 0x966   : > { %2812 = vmatprep.subr.bf16.mxu1 %v3158_v28  ;;  %2834 = vmatprep.subr.bf16.mxu0 %v3159_v31 }
 0x969   : > { %2813 = vmatpush3.bf16.msra.mxu1 %v3160_v34  ;;  %2835 = vmatpush3.bf16.msra.mxu0 %v3161_v37 }
 0x96a   : > { %2814 = vmatprep.subr.bf16.mxu1 %v3162_v38  ;;  %2836 = vmatprep.subr.bf16.mxu0 %v3163_v39 }
 0x96d   : > { %2815 = vmatpush3.bf16.msra.mxu1 %v3164_v40  ;;  %2837 = vmatpush3.bf16.msra.mxu0 %v3165_v41 }
 0xa23   : > { %v1989_v48 = vpop.f32.mrb[44].mxu1  ;;  %v2030_v49 = vpop.f32.mrb[32].mxu0 }
 0xa24   : > { %v3820_v50 = vadd.f32 %v1989_v48, %v1778_v44  ;;  %v3822_v51 = vadd.f32 %v2030_v49, %v1786_v45  ;;  %v1991_v52 = vpop.f32.mrb[45].mxu1  ;;  %v2032_v53 = vpop.f32.mrb[33].mxu0 }
 0xa25   : > { %v3824_v55 = vadd.f32 %v1991_v52, %v1782_v46  ;;  %v3826_v56 = vadd.f32 %v2032_v53, %v1790_v47  ;;  %v1993_v33 = vpop.f32.mrb[46].mxu1  ;;  %v2034_v57 = vpop.f32.mrb[34].mxu0 }
 0xa26   : > { %v3829_v58 = vmul.f32 0.70710677, %v3820_v50  ;;  %v3832_v35 = vmul.f32 0.70710677, %v3822_v51  ;;  %v1994_v2 = vpop.f32.mrb[47].mxu1  ;;  %v2035_v5 = vpop.f32.mrb[35].mxu0 }
 0xa27   : > { %v3835_v59 = vmul.f32 0.70710677, %v3824_v55  ;;  %v3841_v63 = vmul.f32 0.70710677, %v3826_v56 }
 0xa28   : > { %v2053_v60 = vand.u32 2147483647, %v3829_v58  ;;  %v2055_v61 = vand.u32 2147483647, %v3832_v35  ;;  %vm2045_vm9 = vcmp.ge.f32.partialorder %v3829_v58, 0.0  ;;  %vm2047_vm10 = vcmp.ge.f32.partialorder %v3832_v35, 0.0 }
 0xa29   : > { %v2054_v62 = vand.u32 2147483647, %v3835_v59  ;;  %v2056_v8 = vand.u32 2147483647, %v3841_v63  ;;  %vm2046_vm11 = vcmp.ge.f32.partialorder %v3835_v59, 0.0  ;;  %vm2048_vm12 = vcmp.ge.f32.partialorder %v3841_v63, 0.0 }
 0xa2a   : > { %v2057_v54 = vmul.f32 0.3275911, %v2053_v60  ;;  %v2059_v3 = vmul.f32 0.3275911, %v2055_v61  ;;  %v2109_v12 = vsub.f32 0.0, %v2053_v60  ;;  %v2111_v13 = vsub.f32 0.0, %v2055_v61 }
 0xa2b   : > { %v2058_v4 = vmul.f32 0.3275911, %v2054_v62  ;;  %v2060_v10 = vmul.f32 0.3275911, %v2056_v8  ;;  %v2110_v15 = vsub.f32 0.0, %v2054_v62  ;;  %v2112_v20 = vsub.f32 0.0, %v2056_v8 }
 0xa2c   : > { %v2061_v6 = vadd.f32 1.0, %v2057_v54  ;;  %v2063_v7 = vadd.f32 1.0, %v2059_v3  ;;  %v2113_v36 = vmul.f32 %v2109_v12, %v2053_v60  ;;  %v2115_v18 = vmul.f32 %v2111_v13, %v2055_v61 }
 0xa2d   : > { %v2062_v9 = vadd.f32 1.0, %v2058_v4  ;;  %v2064_v11 = vadd.f32 1.0, %v2060_v10  ;;  %v2114_v25 = vmul.f32 %v2110_v15, %v2054_v62  ;;  %v2116_v28 = vmul.f32 %v2112_v20, %v2056_v8 }
 0xa2e   : > { %3200 = vrcp.f32 %v2061_v6  ;;  %v2117_v23 = vmul.f32 1.442695, %v2113_v36  ;;  %v2121_v26 = vmul.f32 1.442695, %v2115_v18 }
 0xa2f   : > { %3202 = vrcp.f32 %v2063_v7  ;;  %v2119_v39 = vmul.f32 1.442695, %v2114_v25  ;;  %v2123_v45 = vmul.f32 1.442695, %v2116_v28 }
 0xa30   : > { %3204 = vrcp.f32 %v2062_v9 }
 0xa31   : > { %3206 = vrcp.f32 %v2064_v11 }
 0xa32   : > { %3208 = vpow2.f32 %v2117_v23 }
 0xa33   : > { %3210 = vpow2.f32 %v2121_v26 }
 0xa34   : > { %3212 = vpow2.f32 %v2119_v39 }
 0xa35   : > { %3214 = vpow2.f32 %v2123_v45 }
 0xa38   : > { %v3201_v14 = vpop.eup %3200 }
 0xa39   : > { %v3203_v16 = vpop.eup %3202  ;;  %v2073_v17 = vmul.f32 1.0614054, %v3201_v14 }
 0xa3a   : > { %v2075_v19 = vmul.f32 1.0614054, %v3203_v16  ;;  %v3205_v22 = vpop.eup %3204 }
 0xa3b   : > { %v2077_v21 = vadd.f32 -1.4531521, %v2073_v17  ;;  %v2074_v27 = vmul.f32 1.0614054, %v3205_v22  ;;  %v3207_v29 = vpop.eup %3206  ;;  %v3371_v17 = vmov -1.0  }
 0xa3c   : > { %v2079_v24 = vadd.f32 -1.4531521, %v2075_v19  ;;  %v2076_v37 = vmul.f32 1.0614054, %v3207_v29  ;;  %v3209_v5 = vpop.eup %3208  ;;  %v2049_v18 = vsel %vm2045_vm9, 1.0, %v3371_v17  ;;  %v2052_v28 = vsel %vm2048_vm12, 1.0, %v3371_v17 }
 0xa3d   : > { %v2081_v1 = vmul.f32 %v3201_v14, %v2077_v21  ;;  %v2078_v34 = vadd.f32 -1.4531521, %v2074_v27  ;;  %v3211_v7 = vpop.eup %3210  ;;  %v2037_v27 = vmul.f32 0.5, %v3820_v50 }
 0xa3e   : > { %v2083_v30 = vmul.f32 %v3203_v16, %v2079_v24  ;;  %v2080_v43 = vadd.f32 -1.4531521, %v2076_v37  ;;  %v3213_v15 = vpop.eup %3212 }
 0xa3f   : > { %v2085_v31 = vadd.f32 1.4214138, %v2081_v1  ;;  %v2082_v41 = vmul.f32 %v3205_v22, %v2078_v34  ;;  %v3215_v21 = vpop.eup %3214  ;;  %v2050_v1 = vsel %vm2046_vm11, 1.0, %v3371_v17 }
 0xa40   : > { %v2087_v38 = vadd.f32 1.4214138, %v2083_v30  ;;  %v2084_v48 = vmul.f32 %v3207_v29, %v2080_v43 }
 0xa41   : > { %v2089_v40 = vmul.f32 %v3201_v14, %v2085_v31  ;;  %v2086_v47 = vadd.f32 1.4214138, %v2082_v41  ;;  %v2038_v31 = vmul.f32 0.5, %v3824_v55 }
 0xa42   : > { %v2091_v44 = vmul.f32 %v3203_v16, %v2087_v38  ;;  %v2088_v33 = vadd.f32 1.4214138, %v2084_v48  ;;  %v2040_v38 = vmul.f32 0.5, %v3826_v56 }
 0xa43   : > { %v2093_v46 = vadd.f32 -0.28449672, %v2089_v40  ;;  %v2090_v53 = vmul.f32 %v3205_v22, %v2086_v47 }
 0xa44   : > { %v2095_v49 = vadd.f32 -0.28449672, %v2091_v44  ;;  %v2092_v62 = vmul.f32 %v3207_v29, %v2088_v33 }
 0xa45   : > { %v2097_v52 = vmul.f32 %v3201_v14, %v2093_v46  ;;  %v2094_v61 = vadd.f32 -0.28449672, %v2090_v53  ;;  %v3218_v46 = vld [vmem:[%s3877_s9] sm:$0xff] }
 0xa46   : > { %v2099_v57 = vmul.f32 %v3203_v16, %v2095_v49  ;;  %v2096_v4 = vadd.f32 -0.28449672, %v2092_v62 }
 0xa47   : > { %v2101_v60 = vadd.f32 0.2548296, %v2097_v52  ;;  %v2098_v3 = vmul.f32 %v3205_v22, %v2094_v61 }
 0xa48   : > { %v2103_v2 = vadd.f32 0.2548296, %v2099_v57  ;;  %v2100_v10 = vmul.f32 %v3207_v29, %v2096_v4 }
 0xa49   : > { %v2105_v54 = vmul.f32 %v3201_v14, %v2101_v60  ;;  %v2102_v9 = vadd.f32 0.2548296, %v2098_v3  ;;  %v2051_v14 = vsel %vm2047_vm10, 1.0, %v3371_v17 }
 0xa4a   : > { %v2107_v6 = vmul.f32 %v3203_v16, %v2103_v2  ;;  %v2104_v36 = vadd.f32 0.2548296, %v2100_v10 }
 0xa4b   : > { %v2125_v8 = vmul.f32 %v3209_v5, %v2105_v54  ;;  %v2106_v13 = vmul.f32 %v3205_v22, %v2102_v9  ;;  %v2508_v9 = vsub.s32 6, %v3624_v32 }
 0xa4c   : > { %v2127_v11 = vmul.f32 %v3211_v7, %v2107_v6  ;;  %v2108_v16 = vmul.f32 %v3207_v29, %v2104_v36  ;;  %v2039_v29 = vmul.f32 0.5, %v3822_v51  ;;  %v2216_v51 = vrot.slane %v3218_v46, %v1785_v42 }
 0xa4d   : > { %v2129_v12 = vsub.f32 1.0, %v2125_v8  ;;  %v2126_v58 = vmul.f32 %v3213_v15, %v2106_v13  ;;  %v2503_v8 = vsub.s32 5, %v3624_v32 }
 0xa4e   : > { %v2131_v19 = vsub.f32 1.0, %v2127_v11  ;;  %v2128_v35 = vmul.f32 %v3215_v21, %v2108_v16 }
 0xa4f   : > { %v2133_v20 = vmul.f32 %v2129_v12, %v2049_v18  ;;  %v2130_v24 = vsub.f32 1.0, %v2126_v58  ;;  %v2504_v10 = vrot.slane %v3218_v46, %v2503_v8  ;;  %v2509_v12 = vrot.slane %v3218_v46, %v2508_v9 }
 0xa50   : > { %v2135_v23 = vmul.f32 %v2131_v19, %v2051_v14  ;;  %v2132_v26 = vsub.f32 1.0, %v2128_v35 }
 0xa51   : > { %v2137_v25 = vadd.f32 1.0, %v2133_v20  ;;  %v2134_v22 = vmul.f32 %v2130_v24, %v2050_v1 }
 0xa52   : > { %v2139_v30 = vadd.f32 1.0, %v2135_v23  ;;  %v2136_v34 = vmul.f32 %v2132_v26, %v2052_v28 }
 0xa53   : > { %v2138_v59 = vadd.f32 1.0, %v2134_v22  ;;  %v2141_v37 = vmul.f32 %v2137_v25, %v2037_v27 }
 0xa54   : > { %v2140_v63 = vadd.f32 1.0, %v2136_v34  ;;  %v2143_v40 = vmul.f32 %v2139_v30, %v2039_v29 }
 0xa55   : > { %v2142_v39 = vmul.f32 %v2138_v59, %v2038_v31  ;;  %v2145_v44 = vpack.c.bf16 %v2141_v37, %v2141_v37 }
 0xa56   : > { %v2144_v43 = vmul.f32 %v2140_v63, %v2040_v38  ;;  %v2147_v50 = vpack.c.bf16 %v2143_v40, %v2143_v40 }
 0xa57   : > { %v2146_v41 = vpack.c.bf16 %v2142_v39, %v2142_v39 }
 0xa58   : > { %v2148_v45 = vpack.c.bf16 %v2144_v43, %v2144_v43 }
 0xa59   : > { %2441 = vmatprep.mubr.bf16.mxu1 %v2146_v41 }
 0xa5a   : > { %2442 = vmatmul.mubr.bf16.vlgmr.msra.gmra.mrb[48].mxu1 %v2145_v44  ;;  %2481 = vmatprep.mubr.bf16.mxu0 %v2148_v45 }
 0xa5b   : > { %2482 = vmatmul.mubr.bf16.vlgmr.msra.gmra.mrb[36].mxu0 %v2147_v50 }
 0xb2d   : > { %v2816_v55 = vpop.f32.mrb[48].mxu1 }
 0xb2e   : > { %v2817_v56 = vpop.f32.mrb[49].mxu1  ;;  %v2838_v47 = vpop.f32.mrb[36].mxu0 }
 0xb2f   : > { %v2818_v48 = vadd.f32 %v2817_v56, %v2816_v55  ;;  %v2819_v49 = vpop.f32.mrb[50].mxu1  ;;  %v2839_v52 = vpop.f32.mrb[37].mxu0 }
 0xb30   : > { %v2820_v53 = vpop.f32.mrb[51].mxu1  ;;  %v2840_v57 = vadd.f32 %v2839_v52, %v2838_v47  ;;  %v2841_v60 = vpop.f32.mrb[38].mxu0 }
 0xb31   : > { %v2444_v33 = vadd.f32 %v2818_v48, %v2216_v51  ;;  %v2842_v61 = vpop.f32.mrb[39].mxu0 }
 0xb33   : > { %v2484_v62 = vadd.f32 %v2840_v57, %v2444_v33 }
 0xb35   : > { %v2489_v2 = vadd.f32 %v2484_v62, %v3806_v0 }
 0xb37   : > { %2490 = vadd.xlane.f32.xlu0 %v2489_v2 }
 0xbc4   : > { %v2491_v54 = vpop.xlane.xlu0 %2490 }
 0xbc5   : > { %v2492_v3 = vmul.f32 0.0078125, %v2491_v54 }
 0xbc7   : > { %v2493_v4 = vsub.f32 %v2489_v2, %v2492_v3 }
 0xbc9   : > { %v2494_v5 = vmul.f32 %v2493_v4, %v2493_v4 }
 0xbcb   : > { %2495 = vadd.xlane.f32.xlu1 %v2494_v5 }
 0xc58   : > { %v2496_v42 = vpop.xlane.xlu1 %2495 }
 0xc59   : > { %v2497_v6 = vmul.f32 0.0078125, %v2496_v42 }
 0xc5b   : > { %v2498_v7 = vadd.f32 1e-12, %v2497_v6 }
 0xc5d   : > { %3216 = vrsqrt.f32 %v2498_v7 }
 0xc67   : > { %v3217_v11 = vpop.eup %3216 }
 0xc68   : > { %v2500_v13 = vmul.f32 %v3217_v11, %v2493_v4 }
 0xc6a   : > { %v2505_v0 = vmul.f32 %v2504_v10, %v2500_v13 }
 0xc6c   : > { %v2510_v36 = vadd.f32 %v2509_v12, %v2505_v0 }
 0xc6e   : > { %2511 = vst [vmem:[%s433_s24] sm:$0xff] %v2510_v36 }
 0xc6f PF: > { %s23_s13 = sadd.s32 1, %s3349_s13  }
 0xc70   : > { %p20_p1 = scmp.ge.s32.totalorder %s23_s13, 4  }
 0xc72   :  { %22 = sbr.rel (!%p20_p1) target bundleno = 3 (0x3), region = 110 }
 0xc79   :  { %2531 = vsyncpa [#allocation4], 1 }
 0xc7a   :  { %2533 = vsyncpa [#allocation4 + $0x1], 1 }
 0xc7b   :  { %2534 = vsyncpa [#allocation6], 1 }
 0xc7c   :  { %2535 = vsyncpa [#allocation9], 1 }

</bundles_post_ra>
